<compile_context>
chip_gen: v7x
topology: tpu7x:2x2x1
jax: 0.10.0
libtpu: 0.0.40
codegen_flags: <defaults>
</compile_context>

<pallas_src>
import functools

import jax
import jax.numpy as jnp
import numpy as np
from jax import lax
from jax.experimental import pallas as pl
from jax.experimental.pallas import tpu as pltpu


def _round_up(v, m):
    return (v + m - 1) // m * m


def _spconv_kernel(x_ref, w_ref, b_ref, o_ref, pad_ref, *,
                   keh, kew, sh, sw, ph, pw, Ho, Wo):
    """One batch element: pad in VMEM -> in-VMEM im2col -> single MXU matmul.

    x_ref:   (H, W, C)         raw channels-last input block
    w_ref:   (keh*kew*C, Co)   extended-kernel weight, (eh, ew, c)-major rows
    b_ref:   (1, Co)           conv bias (f32)
    o_ref:   (Ho*Wo, Co)       output, Co lane-dense
    pad_ref: (Hpad, Wpad, C)   VMEM scratch: asymmetrically padded canvas (f32)
    """
    H, W, C = x_ref.shape

    # 1) All padding (union of structural pads + conv pad) happens here in
    #    VMEM: zero the canvas, then ONE full-lane store at offset (ph+1, pw+1).
    #    No padded HBM intermediate and no per-group masked lane stores.
    pad_ref[...] = jnp.zeros(pad_ref.shape, pad_ref.dtype)
    pad_ref[ph + 1:ph + 1 + H, pw + 1:pw + 1 + W, :] = (
        x_ref[...].astype(pad_ref.dtype))

    # 2) In-VMEM im2col: slice every extended tap straight from the scratch ref
    #    (the padded image is never loaded as a whole value) and concatenate
    #    along the channel/lane axis -> (Ho*Wo, K) LHS.
    hspan = (Ho - 1) * sh + 1
    wspan = (Wo - 1) * sw + 1
    taps = []
    for eh in range(keh):
        for ew in range(kew):
            blk = pad_ref[eh:eh + hspan, ew:ew + wspan, :]
            if sh != 1 or sw != 1:
                # TODO(synk): for stride > 1, verify with pl.lower_as_mlir that
                # this strided slice does not relayout; if it does, pre-split
                # the input by stride phase via the index_map instead.
                blk = blk[::sh, ::sw, :]
            taps.append(blk.reshape(Ho * Wo, C))
    lhs = jnp.concatenate(taps, axis=-1)                 # (Ho*Wo, keh*kew*C)

    # 3) One fat-K MXU matmul (f32 accumulate) + one VPU bias add, lane-dense
    #    store.  Operands are cast to the weight dtype (bf16 when enabled).
    acc = jnp.dot(lhs.astype(w_ref.dtype), w_ref[...],
                  preferred_element_type=jnp.float32)
    o_ref[...] = (acc + b_ref[...]).astype(o_ref.dtype)


def _pack_extended_weight(weight):
    """Fold the 4 per-group corner pads into an extended (kh+1, kw+1) kernel.

    With the structural pad, group q's data sits at offset (dh_q, dw_q) in the
    padded canvas (dh/dw = 1 if that group is padded on top/left).  Absorbing
    the shift into the kernel taps, SpConv2d == a plain conv over a *uniformly*
    padded input with a (kh+1, kw+1) kernel where group q's original (kh, kw)
    kernel is embedded at offset (1-dh_q, 1-dw_q) and the rest is zero.

    Returns (keh*kew*C, Co), rows packed (eh, ew, c)-major to match the
    kernel's im2col column order.
    """
    Co, C, kh, kw = weight.shape
    g = C // 4
    keh, kew = kh + 1, kw + 1
    # group -> (top pad, left pad): g0 TL, g1 TR, g2 BL, g3 BR (PyTorch order).
    deltas = ((1, 1), (1, 0), (0, 1), (0, 0))
    w_ext = jnp.zeros((Co, C, keh, kew), weight.dtype)
    for q, (dh, dw) in enumerate(deltas):
        w_ext = w_ext.at[:, q * g:(q + 1) * g,
                         1 - dh:1 - dh + kh,
                         1 - dw:1 - dw + kw].set(weight[:, q * g:(q + 1) * g])
    return jnp.transpose(w_ext, (2, 3, 1, 0)).reshape(keh * kew * C, Co)


def _tile_bytes(shape, itemsize):
    """Physical VMEM footprint of a block, (8, 128)-tile padded."""
    lead = int(np.prod(shape[:-2])) if len(shape) > 2 else 1
    return lead * _round_up(shape[-2], 8) * _round_up(shape[-1], 128) * itemsize


def spconv2d_forward(x_nchw, weight, bias, *, stride=(1, 1), padding=(0, 0),
                     use_bf16_operands=False):
    """SpConv2d forward. x: (N, C, H, W) -> (N, Co, Ho, Wo)."""
    N, C, H, W = x_nchw.shape
    assert C % 4 == 0, "SpConv2d requires in_channels % 4 == 0"
    Co, Cin, kh, kw = weight.shape
    assert Cin == C
    sh, sw = stride
    ph, pw = padding

    # Output size of the reference Conv2d over the (H+1, W+1) padded canvas.
    Ho = (H + 1 + 2 * ph - kh) // sh + 1
    Wo = (W + 1 + 2 * pw - kw) // sw + 1
    keh, kew = kh + 1, kw + 1
    K = keh * kew * C

    # Loud shape contracts (review): lane-dense output + sublane-aligned rows.
    assert Co % 128 == 0, "out_channels must be a multiple of 128 (lane-dense)"
    assert (Ho * Wo) % 8 == 0 and Wo % 8 == 0, \
        "Ho*Wo and Wo must be multiples of 8 (sublane-aligned im2col)"

    op_dtype = jnp.bfloat16 if use_bf16_operands else jnp.float32
    op_itemsize = 2 if use_bf16_operands else 4

    # channels-last: C -> lanes, W -> sublanes.  (For tiny C this wastes lanes;
    # the fat-K fold in the kernel is what keeps the MXU fed in that regime.)
    x = jnp.transpose(x_nchw, (0, 2, 3, 1)).astype(op_dtype)     # (N, H, W, C)
    w_packed = _pack_extended_weight(weight).astype(op_dtype)    # (K, Co)
    b2 = bias.reshape(1, Co).astype(jnp.float32)

    # Padded-canvas size: holds x at (ph+1, pw+1) and every extended tap window.
    Hpad = max(ph + 1 + H, (Ho - 1) * sh + keh)
    Wpad = max(pw + 1 + W, (Wo - 1) * sw + kew)

    # Per-grid-step VMEM budget (double-buffered in/out blocks + residents).
    vmem_est = (2 * _tile_bytes((H, W, C), op_itemsize)       # input block x2
                + 2 * _tile_bytes((Ho * Wo, Co), 4)           # output block x2
                + _tile_bytes((Hpad, Wpad, C), 4)             # pad scratch (f32)
                + _tile_bytes((K, Co), op_itemsize)           # resident weight
                + _tile_bytes((1, Co), 4)                     # resident bias
                + _tile_bytes((Ho * Wo, K), 4)                # im2col LHS
                + _tile_bytes((Ho * Wo, Co), 4))              # f32 accumulator
    assert vmem_est < 40 * 1024 * 1024, (
        f"per-step VMEM ~{vmem_est / 2**20:.1f} MiB: too large for a single "
        "whole-image grid step (would not survive v7x's 64 MiB VMEM); add the "
        "Ho row-tile grid axis (see TODO(synk)) for this shape.")

    kernel = functools.partial(_spconv_kernel, keh=keh, kew=kew, sh=sh, sw=sw,
                               ph=ph, pw=pw, Ho=Ho, Wo=Wo)

    flops = 2 * N * Ho * Wo * K * Co
    bytes_accessed = (x.size * op_itemsize + w_packed.size * op_itemsize
                      + b2.size * 4 + N * Ho * Wo * Co * 4)

    y = pl.pallas_call(
        kernel,
        out_shape=jax.ShapeDtypeStruct((N, Ho * Wo, Co), jnp.float32),
        grid=(N,),
        in_specs=[
            pl.BlockSpec((None, H, W, C), lambda n: (n, 0, 0, 0)),  # per-batch
            pl.BlockSpec((K, Co), lambda n: (0, 0)),                # resident
            pl.BlockSpec((1, Co), lambda n: (0, 0)),                # resident
        ],
        out_specs=pl.BlockSpec((None, Ho * Wo, Co), lambda n: (n, 0, 0)),
        # Scratch stays f32 even in bf16 mode: the unaligned (ph+1, pw+1) store
        # keeps an unpacked 32-bit layout; the bf16 savings are on the
        # HBM-facing x / weight blocks and the MXU operands.
        scratch_shapes=[pltpu.VMEM((Hpad, Wpad, C), jnp.float32)],
        compiler_params=pltpu.CompilerParams(
            # On v7x, use pltpu.CORE_PARALLEL here (or pl.core_map over
            # create_tensorcore_mesh) to shard the batch over both TensorCores;
            # plain "parallel" is kept for portable lowering on v5e/v6e.
            dimension_semantics=("parallel",),
            vmem_limit_bytes=48 * 1024 * 1024,
        ),
        cost_estimate=pl.CostEstimate(
            flops=flops, transcendentals=0, bytes_accessed=bytes_accessed),
    )(x, w_packed, b2)

    y = y.reshape(N, Ho, Wo, Co)
    return jnp.transpose(y, (0, 3, 1, 2))        # back to NCHW (N, Co, Ho, Wo)


# ----------------------------- pure-JAX reference ---------------------------
def _ref_spconv2d(x, weight, bias, *, stride, padding):
    n, c, h, w = x.shape
    g = c // 4
    x1 = jnp.pad(x[:, 0 * g:1 * g], ((0, 0), (0, 0), (1, 0), (1, 0)))
    x2 = jnp.pad(x[:, 1 * g:2 * g], ((0, 0), (0, 0), (1, 0), (0, 1)))
    x3 = jnp.pad(x[:, 2 * g:3 * g], ((0, 0), (0, 0), (0, 1), (1, 0)))
    x4 = jnp.pad(x[:, 3 * g:4 * g], ((0, 0), (0, 0), (0, 1), (0, 1)))
    xp = jnp.concatenate([x1, x2, x3, x4], axis=1)
    y = lax.conv_general_dilated(
        xp, weight, window_strides=stride,
        padding=[(padding[0], padding[0]), (padding[1], padding[1])],
        dimension_numbers=("NCHW", "OIHW", "NCHW"))
    return y + bias[None, :, None, None]


if __name__ == "__main__":
    key = jax.random.PRNGKey(0)
    k_x, k_w, k_b = jax.random.split(key, 3)

    # SpConv2d(in_channels=4, out_channels=128, kernel_size=2, stride=1, padding=0)
    N, C, H, W = 2, 4, 16, 16
    Co, kh, kw = 128, 2, 2            # even-sized kernel; lane-dense out channels
    stride, padding = (1, 1), (0, 0)

    fan_in = C * kh * kw
    bound = 1.0 / np.sqrt(fan_in)
    weight = jax.random.uniform(k_w, (Co, C, kh, kw), jnp.float32, -bound, bound)
    bias = jax.random.uniform(k_b, (Co,), jnp.float32, -bound, bound)
    x = jax.random.normal(k_x, (N, C, H, W), jnp.float32)

    ref = _ref_spconv2d(x, weight, bias, stride=stride, padding=padding)

    # Default f32-operand path: exact self-check.
    fwd = jax.jit(functools.partial(spconv2d_forward, stride=stride, padding=padding))
    out = jax.block_until_ready(fwd(x, weight, bias))
    assert out.shape == (N, Co, H, W), out.shape
    np.testing.assert_allclose(np.asarray(out), np.asarray(ref), rtol=1e-4, atol=1e-4)

    # bf16-MXU-operand path (v6e/v7x DMA + MXU-rate optimization): looser check.
    fwd_bf16 = jax.jit(functools.partial(spconv2d_forward, stride=stride,
                                         padding=padding, use_bf16_operands=True))
    out_bf16 = jax.block_until_ready(fwd_bf16(x, weight, bias))
    np.testing.assert_allclose(np.asarray(out_bf16), np.asarray(ref),
                               rtol=3e-2, atol=3e-2)

    print("KERNEL_OK")
</pallas_src>

<mosaic_0001>
module attributes {stable_mosaic.version = 11 : i64} {
  func.func @_spconv_kernel(%arg0: i32, %arg1: memref<1x16x16x4xf32, #tpu.memory_space<vmem>>, %arg2: memref<36x128xf32, #tpu.memory_space<vmem>>, %arg3: memref<1x128xf32, #tpu.memory_space<vmem>>, %arg4: memref<1x256x128xf32, #tpu.memory_space<vmem>>, %arg5: memref<18x18x4xf32, #tpu.memory_space<vmem>>) attributes {dimension_semantics = [#tpu.dimension_semantics<parallel>], iteration_bounds = array<i64: 2>, scalar_prefetch = 0 : i64, scratch_operands = 1 : i64, tpu.core_type = #tpu.core_type<tc>, window_params = [{transform_indices = @transform_0, window_bounds = array<i64: 1, 16, 16, 4>}, {pipeline_mode = #tpu.pipeline_mode<synchronous>, transform_indices = @transform_1, window_bounds = array<i64: 36, 128>}, {pipeline_mode = #tpu.pipeline_mode<synchronous>, transform_indices = @transform_2, window_bounds = array<i64: 1, 128>}, {transform_indices = @transform_3, window_bounds = array<i64: 1, 256, 128>}]} {
    %cst = arith.constant 0.000000e+00 : f32
    %0 = vector.broadcast %cst : f32 to vector<18x18x4xf32>
    %c0 = arith.constant 0 : index
    %c0_0 = arith.constant 0 : index
    %c0_1 = arith.constant 0 : index
    %1 = vector.load %arg5[%c0, %c0_0, %c0_1] : memref<18x18x4xf32, #tpu.memory_space<vmem>>, vector<18x18x4xf32>
    tpu.vector_store %arg5[%c0, %c0_0, %c0_1], %0 {strides = array<i32>} : memref<18x18x4xf32, #tpu.memory_space<vmem>>, vector<18x18x4xf32>,
    %c0_2 = arith.constant 0 : index
    %c0_3 = arith.constant 0 : index
    %c0_4 = arith.constant 0 : index
    %c0_5 = arith.constant 0 : index
    %2 = vector.load %arg1[%c0_2, %c0_3, %c0_4, %c0_5] : memref<1x16x16x4xf32, #tpu.memory_space<vmem>>, vector<1x16x16x4xf32>
    %3 = vector.shape_cast %2 : vector<1x16x16x4xf32> to vector<16x16x4xf32>
    %c1 = arith.constant 1 : index
    %c1_6 = arith.constant 1 : index
    %c0_7 = arith.constant 0 : index
    %4 = vector.load %arg5[%c1, %c1_6, %c0_7] : memref<18x18x4xf32, #tpu.memory_space<vmem>>, vector<16x16x4xf32>
    tpu.vector_store %arg5[%c1, %c1_6, %c0_7], %3 {strides = array<i32>} : memref<18x18x4xf32, #tpu.memory_space<vmem>>, vector<16x16x4xf32>,
    %c0_8 = arith.constant 0 : index
    %c0_9 = arith.constant 0 : index
    %c0_10 = arith.constant 0 : index
    %5 = vector.load %arg5[%c0_8, %c0_9, %c0_10] : memref<18x18x4xf32, #tpu.memory_space<vmem>>, vector<16x16x4xf32>
    %6 = vector.shape_cast %5 : vector<16x16x4xf32> to vector<256x4xf32>
    %c0_11 = arith.constant 0 : index
    %c1_12 = arith.constant 1 : index
    %c0_13 = arith.constant 0 : index
    %7 = vector.load %arg5[%c0_11, %c1_12, %c0_13] : memref<18x18x4xf32, #tpu.memory_space<vmem>>, vector<16x16x4xf32>
    %8 = vector.shape_cast %7 : vector<16x16x4xf32> to vector<256x4xf32>
    %c0_14 = arith.constant 0 : index
    %c2 = arith.constant 2 : index
    %c0_15 = arith.constant 0 : index
    %9 = vector.load %arg5[%c0_14, %c2, %c0_15] : memref<18x18x4xf32, #tpu.memory_space<vmem>>, vector<16x16x4xf32>
    %10 = vector.shape_cast %9 : vector<16x16x4xf32> to vector<256x4xf32>
    %c1_16 = arith.constant 1 : index
    %c0_17 = arith.constant 0 : index
    %c0_18 = arith.constant 0 : index
    %11 = vector.load %arg5[%c1_16, %c0_17, %c0_18] : memref<18x18x4xf32, #tpu.memory_space<vmem>>, vector<16x16x4xf32>
    %12 = vector.shape_cast %11 : vector<16x16x4xf32> to vector<256x4xf32>
    %c1_19 = arith.constant 1 : index
    %c1_20 = arith.constant 1 : index
    %c0_21 = arith.constant 0 : index
    %13 = vector.load %arg5[%c1_19, %c1_20, %c0_21] : memref<18x18x4xf32, #tpu.memory_space<vmem>>, vector<16x16x4xf32>
    %14 = vector.shape_cast %13 : vector<16x16x4xf32> to vector<256x4xf32>
    %c1_22 = arith.constant 1 : index
    %c2_23 = arith.constant 2 : index
    %c0_24 = arith.constant 0 : index
    %15 = vector.load %arg5[%c1_22, %c2_23, %c0_24] : memref<18x18x4xf32, #tpu.memory_space<vmem>>, vector<16x16x4xf32>
    %16 = vector.shape_cast %15 : vector<16x16x4xf32> to vector<256x4xf32>
    %c2_25 = arith.constant 2 : index
    %c0_26 = arith.constant 0 : index
    %c0_27 = arith.constant 0 : index
    %17 = vector.load %arg5[%c2_25, %c0_26, %c0_27] : memref<18x18x4xf32, #tpu.memory_space<vmem>>, vector<16x16x4xf32>
    %18 = vector.shape_cast %17 : vector<16x16x4xf32> to vector<256x4xf32>
    %c2_28 = arith.constant 2 : index
    %c1_29 = arith.constant 1 : index
    %c0_30 = arith.constant 0 : index
    %19 = vector.load %arg5[%c2_28, %c1_29, %c0_30] : memref<18x18x4xf32, #tpu.memory_space<vmem>>, vector<16x16x4xf32>
    %20 = vector.shape_cast %19 : vector<16x16x4xf32> to vector<256x4xf32>
    %c2_31 = arith.constant 2 : index
    %c2_32 = arith.constant 2 : index
    %c0_33 = arith.constant 0 : index
    %21 = vector.load %arg5[%c2_31, %c2_32, %c0_33] : memref<18x18x4xf32, #tpu.memory_space<vmem>>, vector<16x16x4xf32>
    %22 = vector.shape_cast %21 : vector<16x16x4xf32> to vector<256x4xf32>
    %23 = tpu.concatenate %6, %8, %10, %12, %14, %16, %18, %20, %22 in 1 : vector<256x4xf32>, vector<256x4xf32>, vector<256x4xf32>, vector<256x4xf32>, vector<256x4xf32>, vector<256x4xf32>, vector<256x4xf32>, vector<256x4xf32>, vector<256x4xf32> -> vector<256x36xf32>
    %c0_34 = arith.constant 0 : index
    %c0_35 = arith.constant 0 : index
    %24 = vector.load %arg2[%c0_34, %c0_35] : memref<36x128xf32, #tpu.memory_space<vmem>>, vector<36x128xf32>
    %cst_36 = arith.constant dense<0.000000e+00> : vector<256x128xf32>
    %25 = tpu.matmul %23, %24, %cst_36 {dimension_numbers = #tpu.dot_dimension_numbers<[1], [0], [0], [1], [0, 0, 1, 1], [], []>} : vector<256x36xf32>, vector<36x128xf32>, vector<256x128xf32> -> vector<256x128xf32>
    %c0_37 = arith.constant 0 : index
    %c0_38 = arith.constant 0 : index
    %26 = vector.load %arg3[%c0_37, %c0_38] : memref<1x128xf32, #tpu.memory_space<vmem>>, vector<1x128xf32>
    %27 = vector.broadcast %26 : vector<1x128xf32> to vector<256x128xf32>
    %28 = arith.addf %25, %27 : vector<256x128xf32>
    %c0_39 = arith.constant 0 : index
    %c0_40 = arith.constant 0 : index
    %c0_41 = arith.constant 0 : index
    %29 = vector.load %arg4[%c0_39, %c0_40, %c0_41] : memref<1x256x128xf32, #tpu.memory_space<vmem>>, vector<1x256x128xf32>
    %30 = vector.shape_cast %29 : vector<1x256x128xf32> to vector<256x128xf32>
    %31 = vector.shape_cast %28 : vector<256x128xf32> to vector<1x256x128xf32>
    tpu.vector_store %arg4[%c0_39, %c0_40, %c0_41], %31 {strides = array<i32>} : memref<1x256x128xf32, #tpu.memory_space<vmem>>, vector<1x256x128xf32>,
    return
  }
  func.func @transform_0(%arg0: i32) -> (i32, i32, i32, i32) {
    %c0_i32 = arith.constant 0 : i32
    %c0_i32_0 = arith.constant 0 : i32
    %c0_i32_1 = arith.constant 0 : i32
    %c0_i32_2 = arith.constant 0 : i32
    return %arg0, %c0_i32, %c0_i32_0, %c0_i32_1 : i32, i32, i32, i32
  }
  func.func @transform_1(%arg0: i32) -> (i32, i32) {
    %c0_i32 = arith.constant 0 : i32
    %c0_i32_0 = arith.constant 0 : i32
    %c0_i32_1 = arith.constant 0 : i32
    return %c0_i32, %c0_i32_0 : i32, i32
  }
  func.func @transform_2(%arg0: i32) -> (i32, i32) {
    %c0_i32 = arith.constant 0 : i32
    %c0_i32_0 = arith.constant 0 : i32
    %c0_i32_1 = arith.constant 0 : i32
    return %c0_i32, %c0_i32_0 : i32, i32
  }
  func.func @transform_3(%arg0: i32) -> (i32, i32, i32) {
    %c0_i32 = arith.constant 0 : i32
    %c0_i32_0 = arith.constant 0 : i32
    %c0_i32_1 = arith.constant 0 : i32
    return %arg0, %c0_i32, %c0_i32_0 : i32, i32, i32
  }
}

</mosaic_0001>

<bundles_post_ra>
// kernel: spconv2d_forward.1
= control target key start
LH: loop header
LB: loop body
LE: loop exit
PB: predicated region body
PF: predicated region fallthrough
CT: control target
= control target key end

     0   :  { %8 = vsyncpa [#allocation4], 0  ;;  %s4182_s0 = inlined_call_operand.vmem [shape: f32[2,16,16,4], index: 0, kind: input, shape index: {}]   ;;  %s4183_s1 = inlined_call_operand.vmem [shape: f32[36,128], index: 1, kind: input, shape index: {}]   ;;  %s4184_s2 = inlined_call_operand.vmem [shape: f32[1,128], index: 2, kind: input, shape index: {}]   ;;  %s4185_s3 = inlined_call_operand.hbm [shape: f32[2,256,128], index: 3, kind: output, shape index: {}]  }
   0x1   :  { %10 = vsyncpa [#allocation4 + $0x1], 0  ;;  %s2632_s12 = smov 0   ;;  %s2634_s13 = smov 0  }
   0x2   :  { %s2636_s14 = smov 0   ;;  %s2638_s15 = smov 0  }
   0x3 LB: > { %s2653_s16 = sadd.s32 4294967295, %s2599_s15   ;;  %s2312_s17 = sadd.s32 4294967294, %s2599_s15   ;;  %s2599_s15 = sphi %s2638_s15, %s4344_s15   ;;  %s2595_s14 = sphi %s2636_s14, %s4343_s14   ;;  %s2591_s13 = sphi %s2634_s13, %s4342_s13   ;;  %s2587_s12 = sphi %s2632_s12, %s4341_s12  }
   0x4   : > { %s2657_s18 = sadd.s32 1, %s2599_s15   ;;  %s91_s19 = sadd.s32 1, %s2595_s14 }
   0x5   : > { %s88_s20 = ssub.s32 %s2599_s15, %s2657_s18  ;;  %p101_p0 = scmp.ne.s32.totalorder %s2595_s14, %s2591_s13 }
   0x6   : > { %p89_p1 = scmp.eq.s32.totalorder %s88_s20, 0  ;;  %p102_p2 = scmp.eq.s32.totalorder %s2653_s16, 1 }
   0x7   : > { %p107_p3 = scmp.ne.s32.totalorder %s2591_s13, %s2587_s12  ;;  %p108_p4 = scmp.eq.s32.totalorder %s2312_s17, 1 }
   0x8   : > { %s2668_s21 = scalar_select %p89_p1, %s2595_s14, %s91_s19  }
   0x9   : > { %p2670_p5 = por %p102_p2, %p101_p0  ;;  %p2674_p6 = por %p108_p4, %p107_p3 }
   0xa   : > { %p2315_p7 = scmp.ge.s32.totalorder %s2599_s15, 1  ;;  %p140_p8 = scmp.lt.s32.totalorder %s2599_s15, 3 }
   0xc   : > { %p141_p9 = pnand %p2315_p7, %p140_p8 }
   0xe   : > { %144 = sbr.rel (%p141_p9) target bundleno = 911 (0x38f), region = 32 }
  0x15   : > { %vm169_vm0 = vcmask 31744   ;;  %vm172_vm1 = vcmask 25600   ;;  %p164_p10 = scmp.lt.s32.totalorder %s2653_s16, 1  ;;  %v2601_v0 = vmov 0.0   ;;  %s2602_s29 = smov 4   ;;  %vm1975_vm2 = vcmask 1043456  }
  0x16   : > { %170 = vst.msk [vmem:[#allocation2] sm:$0xff] %vm169_vm0, %v2601_v0  ;;  %171 = vst.msk [vmem:[#allocation2 + $0x8] sm:$0xff] %vm169_vm0, %v2601_v0  ;;  %s2603_s30 = smov 8   ;;  %s2604_s4 = smov 12   ;;  %vm1635_vm3 = vcmask 64512   ;;  %vm1668_vm4 = vcmask 97280  }
  0x17   : > { %174 = vst.msk [vmem:[#allocation2 + $0x18] sm:$0xff] %vm169_vm0, %v2601_v0  ;;  %175 = vst.msk [vmem:[#allocation2 + $0x20] sm:$0xff] %vm169_vm0, %v2601_v0  ;;  %s165_s24 = scalar_select %p164_p10, %s2653_s16, 1  ;;  %vm1701_vm5 = vcmask 130048   ;;  %vm1734_vm6 = vcmask 162816   ;;  %vm1767_vm7 = vcmask 195584  }
  0x18   : > { %177 = vst.msk [vmem:[#allocation2 + $0x30] sm:$0xff] %vm169_vm0, %v2601_v0  ;;  %178 = vst.msk [vmem:[#allocation2 + $0x38] sm:$0xff] %vm169_vm0, %v2601_v0  ;;  %s2605_s5 = smov 16   ;;  %s2606_s6 = smov 20   ;;  %vm1833_vm8 = vcmask 261120   ;;  %vm1800_vm9 = vcmask 228352  }
  0x19   : > { %180 = vst.msk [vmem:[#allocation2 + $0x48] sm:$0xff] %vm169_vm0, %v2601_v0  ;;  %181 = vst.msk [vmem:[#allocation2 + $0x50] sm:$0xff] %vm169_vm0, %v2601_v0  ;;  %s2358_s25 = sshll.u32 %s165_s24, 8  ;;  %s2607_s7 = smov 24   ;;  %vm1878_vm10 = vcmask 293888  }
  0x1a   : > { %183 = vst.msk [vmem:[#allocation2 + $0x60] sm:$0xff] %vm169_vm0, %v2601_v0  ;;  %184 = vst.msk [vmem:[#allocation2 + $0x68] sm:$0xff] %vm169_vm0, %v2601_v0  ;;  %s2741_s28 = scalar_lea.vmem %s4182_s0, %s2358_s25  ;;  %s2608_s25 = smov 28  }
  0x1b   : > { %186 = vst.msk [vmem:[#allocation2 + $0x78] sm:$0xff] %vm169_vm0, %v2601_v0  ;;  %187 = vst.msk [vmem:[#allocation2 + $0x80] sm:$0xff] %vm169_vm0, %v2601_v0  ;;  %v225_v1 = vld [vmem:[%s2741_s28] sm:$0xff]  ;;  %v227_v2 = vld [vmem:[%s2741_s28 + $0x10] sm:$0xff]  ;;  %s2359_s8 = sshll.u32 %s2653_s16, 12  ;;  %s2610_s20 = smov [#allocation3]  }
  0x1c   : > { %189 = vst.msk [vmem:[#allocation2 + $0x90] sm:$0xff] %vm169_vm0, %v2601_v0  ;;  %190 = vst.msk [vmem:[#allocation2 + $0x98] sm:$0xff] %vm169_vm0, %v2601_v0  ;;  %v226_v3 = vld [vmem:[%s2741_s28 + $0x8] sm:$0xff]  ;;  %v229_v4 = vld [vmem:[%s2741_s28 + $0x20] sm:$0xff]  ;;  %s4131_s17 = scalar_lea.hbm %s4185_s3, %s2359_s8  ;;  %s2541_s24 = sshll.u32 %s2610_s20, 4  ;;  %s2542_s24 = int_to_ptr.vmem [resolvable:$false] %s2541_s24 }
  0x1d   : > { %192 = vst.msk [vmem:[#allocation2 + $0xa8] sm:$0xff] %vm169_vm0, %v2601_v0  ;;  %193 = vst.msk [vmem:[#allocation2 + $0xb0] sm:$0xff] %vm169_vm0, %v2601_v0  ;;  %v228_v5 = vld [vmem:[%s2741_s28 + $0x18] sm:$0xff]  ;;  %v231_v6 = vld [vmem:[%s2741_s28 + $0x30] sm:$0xff] }
  0x1e   : > { %195 = vst.msk [vmem:[#allocation2 + $0xc0] sm:$0xff] %vm169_vm0, %v2601_v0  ;;  %196 = vst.msk [vmem:[#allocation2 + $0xc8] sm:$0xff] %vm169_vm0, %v2601_v0  ;;  %v322_v7 = vld [vmem:[#allocation2 + $0x1] sm:$0xff]  ;;  %v232_v11 = vld [vmem:[%s2741_s28 + $0x38] sm:$0xff] }
  0x1f   : > { %198 = vst.msk [vmem:[#allocation2 + $0xd8] sm:$0xff] %vm169_vm0, %v2601_v0  ;;  %199 = vst.msk [vmem:[#allocation2 + $0xe0] sm:$0xff] %vm169_vm0, %v2601_v0  ;;  %v230_v9 = vld [vmem:[%s2741_s28 + $0x28] sm:$0xff]  ;;  %611 = vrot.lane.b32.xlu0 %v322_v7, %s2602_s29  ;;  %v233_v10 = vld [vmem:[%s2741_s28 + $0x40] sm:$0xff] }
  0x20   : > { %201 = vst.msk [vmem:[#allocation2 + $0xf0] sm:$0xff] %vm169_vm0, %v2601_v0  ;;  %202 = vst.msk [vmem:[#allocation2 + $0xf8] sm:$0xff] %vm169_vm0, %v2601_v0  ;;  %v235_v12 = vld [vmem:[%s2741_s28 + $0x50] sm:$0xff]  ;;  %v234_v13 = vld [vmem:[%s2741_s28 + $0x48] sm:$0xff] }
  0x21   : > { %204 = vst.msk [vmem:[#allocation2 + $0x108] sm:$0xff] %vm169_vm0, %v2601_v0  ;;  %205 = vst.msk [vmem:[#allocation2 + $0x110] sm:$0xff] %vm169_vm0, %v2601_v0  ;;  %v237_v14 = vld [vmem:[%s2741_s28 + $0x60] sm:$0xff]  ;;  %v236_v15 = vld [vmem:[%s2741_s28 + $0x58] sm:$0xff] }
  0x22   : > { %207 = vst.msk [vmem:[#allocation2 + $0x120] sm:$0xff] %vm169_vm0, %v2601_v0  ;;  %208 = vst.msk [vmem:[#allocation2 + $0x128] sm:$0xff] %vm169_vm0, %v2601_v0  ;;  %v239_v16 = vld [vmem:[%s2741_s28 + $0x70] sm:$0xff]  ;;  %v238_v17 = vld [vmem:[%s2741_s28 + $0x68] sm:$0xff] }
  0x23   : > { %210 = vst.msk [vmem:[#allocation2 + $0x138] sm:$0xff] %vm169_vm0, %v2601_v0  ;;  %211 = vst.msk [vmem:[#allocation2 + $0x140] sm:$0xff] %vm169_vm0, %v2601_v0  ;;  %v241_v18 = vld [vmem:[%s2741_s28 + $0x80] sm:$0xff]  ;;  %v240_v19 = vld [vmem:[%s2741_s28 + $0x78] sm:$0xff] }
  0x24   : > { %213 = vst.msk [vmem:[#allocation2 + $0x150] sm:$0xff] %vm169_vm0, %v2601_v0  ;;  %214 = vst.msk [vmem:[#allocation2 + $0x158] sm:$0xff] %vm169_vm0, %v2601_v0  ;;  %v243_v20 = vld [vmem:[%s2741_s28 + $0x90] sm:$0xff]  ;;  %v242_v21 = vld [vmem:[%s2741_s28 + $0x88] sm:$0xff] }
  0x25   : > { %216 = vst.msk [vmem:[#allocation2 + $0x168] sm:$0xff] %vm169_vm0, %v2601_v0  ;;  %217 = vst.msk [vmem:[#allocation2 + $0x170] sm:$0xff] %vm169_vm0, %v2601_v0  ;;  %v245_v22 = vld [vmem:[%s2741_s28 + $0xa0] sm:$0xff]  ;;  %v244_v23 = vld [vmem:[%s2741_s28 + $0x98] sm:$0xff] }
  0x26   : > { %219 = vst.msk [vmem:[#allocation2 + $0x180] sm:$0xff] %vm169_vm0, %v2601_v0  ;;  %220 = vst.msk [vmem:[#allocation2 + $0x188] sm:$0xff] %vm169_vm0, %v2601_v0  ;;  %v247_v24 = vld [vmem:[%s2741_s28 + $0xb0] sm:$0xff]  ;;  %v246_v28 = vld [vmem:[%s2741_s28 + $0xa8] sm:$0xff] }
  0x27   : > { %222 = vst.msk [vmem:[#allocation2 + $0x198] sm:$0xff] %vm169_vm0, %v2601_v0  ;;  %223 = vst.msk [vmem:[#allocation2 + $0x1a0] sm:$0xff] %vm169_vm0, %v2601_v0  ;;  %v249_v29 = vld [vmem:[%s2741_s28 + $0xc0] sm:$0xff]  ;;  %v248_v33 = vld [vmem:[%s2741_s28 + $0xb8] sm:$0xff] }
  0x28   : > { %173 = vst.msk [vmem:[#allocation2 + $0x10] sm:$0x3] %vm172_vm1, %v2601_v0  ;;  %176 = vst.msk [vmem:[#allocation2 + $0x28] sm:$0x3] %vm172_vm1, %v2601_v0  ;;  %v251_v34 = vld [vmem:[%s2741_s28 + $0xd0] sm:$0xff]  ;;  %v250_v35 = vld [vmem:[%s2741_s28 + $0xc8] sm:$0xff] }
  0x29   : > { %179 = vst.msk [vmem:[#allocation2 + $0x40] sm:$0x3] %vm172_vm1, %v2601_v0  ;;  %182 = vst.msk [vmem:[#allocation2 + $0x58] sm:$0x3] %vm172_vm1, %v2601_v0  ;;  %v253_v36 = vld [vmem:[%s2741_s28 + $0xe0] sm:$0xff]  ;;  %v252_v37 = vld [vmem:[%s2741_s28 + $0xd8] sm:$0xff] }
  0x2a   : > { %185 = vst.msk [vmem:[#allocation2 + $0x70] sm:$0x3] %vm172_vm1, %v2601_v0  ;;  %188 = vst.msk [vmem:[#allocation2 + $0x88] sm:$0x3] %vm172_vm1, %v2601_v0  ;;  %v254_v39 = vld [vmem:[%s2741_s28 + $0xe8] sm:$0xff]  ;;  %v255_v58 = vld [vmem:[%s2741_s28 + $0xf0] sm:$0xff] }
  0x2b   : > { %191 = vst.msk [vmem:[#allocation2 + $0xa0] sm:$0x3] %vm172_vm1, %v2601_v0  ;;  %194 = vst.msk [vmem:[#allocation2 + $0xb8] sm:$0x3] %vm172_vm1, %v2601_v0  ;;  %v256_v62 = vld [vmem:[%s2741_s28 + $0xf8] sm:$0xff]  ;;  %s2609_s28 = smov 32  }
  0x2c   : > { %197 = vst.msk [vmem:[#allocation2 + $0xd0] sm:$0x3] %vm172_vm1, %v2601_v0  ;;  %200 = vst.msk [vmem:[#allocation2 + $0xe8] sm:$0x3] %vm172_vm1, %v2601_v0 }
  0x2d   : > { %203 = vst.msk [vmem:[#allocation2 + $0x100] sm:$0x3] %vm172_vm1, %v2601_v0  ;;  %206 = vst.msk [vmem:[#allocation2 + $0x118] sm:$0x3] %vm172_vm1, %v2601_v0 }
  0x2e   : > { %209 = vst.msk [vmem:[#allocation2 + $0x130] sm:$0x3] %vm172_vm1, %v2601_v0  ;;  %212 = vst.msk [vmem:[#allocation2 + $0x148] sm:$0x3] %vm172_vm1, %v2601_v0 }
  0x2f   : > { %215 = vst.msk [vmem:[#allocation2 + $0x160] sm:$0x3] %vm172_vm1, %v2601_v0  ;;  %218 = vst.msk [vmem:[#allocation2 + $0x178] sm:$0x3] %vm172_vm1, %v2601_v0  ;;  %v323_v8 = vld [vmem:[#allocation2 + $0x9] sm:$0xff] }
  0x30   : > { %221 = vst.msk [vmem:[#allocation2 + $0x190] sm:$0x3] %vm172_vm1, %v2601_v0  ;;  %224 = vst.msk [vmem:[#allocation2 + $0x1a8] sm:$0x3] %vm172_vm1, %v2601_v0  ;;  %613 = vrot.lane.b32.xlu0 %v323_v8, %s2602_s29  ;;  %v354_v0 = vld [vmem:[#allocation2 + $0x2] sm:$0xff] }
  0x31   : > { %258 = vst.msk [vmem:[#allocation2 + $0x19] sm:$0xff] %vm169_vm0, %v225_v1  ;;  %260 = vst.msk [vmem:[#allocation2 + $0x31] sm:$0xff] %vm169_vm0, %v227_v2 }
  0x32   : > { %259 = vst.msk [vmem:[#allocation2 + $0x21] sm:$0xff] %vm169_vm0, %v226_v3  ;;  %262 = vst.msk [vmem:[#allocation2 + $0x49] sm:$0xff] %vm169_vm0, %v229_v4  ;;  %v355_v3 = vld [vmem:[#allocation2 + $0xa] sm:$0xff] }
  0x33   : > { %261 = vst.msk [vmem:[#allocation2 + $0x39] sm:$0xff] %vm169_vm0, %v228_v5  ;;  %264 = vst.msk [vmem:[#allocation2 + $0x61] sm:$0xff] %vm169_vm0, %v231_v6 }
  0x34   : > { %263 = vst.msk [vmem:[#allocation2 + $0x51] sm:$0xff] %vm169_vm0, %v230_v9  ;;  %266 = vst.msk [vmem:[#allocation2 + $0x79] sm:$0xff] %vm169_vm0, %v233_v10 }
  0x35   : > { %265 = vst.msk [vmem:[#allocation2 + $0x69] sm:$0xff] %vm169_vm0, %v232_v11  ;;  %268 = vst.msk [vmem:[#allocation2 + $0x91] sm:$0xff] %vm169_vm0, %v235_v12 }
  0x36   : > { %267 = vst.msk [vmem:[#allocation2 + $0x81] sm:$0xff] %vm169_vm0, %v234_v13  ;;  %270 = vst.msk [vmem:[#allocation2 + $0xa9] sm:$0xff] %vm169_vm0, %v237_v14 }
  0x37   : > { %269 = vst.msk [vmem:[#allocation2 + $0x99] sm:$0xff] %vm169_vm0, %v236_v15  ;;  %272 = vst.msk [vmem:[#allocation2 + $0xc1] sm:$0xff] %vm169_vm0, %v239_v16 }
  0x38   : > { %271 = vst.msk [vmem:[#allocation2 + $0xb1] sm:$0xff] %vm169_vm0, %v238_v17  ;;  %274 = vst.msk [vmem:[#allocation2 + $0xd9] sm:$0xff] %vm169_vm0, %v241_v18  ;;  %v2786_v25 = vld [vmem:[#allocation2 + $0x19] sm:$0xff]  ;;  %v2788_v26 = vld [vmem:[#allocation2 + $0x31] sm:$0xff] }
  0x39   : > { %273 = vst.msk [vmem:[#allocation2 + $0xc9] sm:$0xff] %vm169_vm0, %v240_v19  ;;  %276 = vst.msk [vmem:[#allocation2 + $0xf1] sm:$0xff] %vm169_vm0, %v243_v20  ;;  %615 = vrot.lane.b32.xlu1 %v2786_v25, %s2602_s29  ;;  %v2795_v27 = vld [vmem:[#allocation2 + $0x21] sm:$0xff]  ;;  %619 = vrot.lane.b32.xlu0 %v2788_v26, %s2602_s29  ;;  %v2803_v30 = vld [vmem:[#allocation2 + $0x49] sm:$0xff] }
  0x3a   : > { %275 = vst.msk [vmem:[#allocation2 + $0xe1] sm:$0xff] %vm169_vm0, %v242_v21  ;;  %278 = vst.msk [vmem:[#allocation2 + $0x109] sm:$0xff] %vm169_vm0, %v245_v22  ;;  %v2807_v31 = vld [vmem:[#allocation2 + $0x39] sm:$0xff]  ;;  %v330_v32 = vld [vmem:[#allocation2 + $0x61] sm:$0xff] }
  0x3b   : > { %277 = vst.msk [vmem:[#allocation2 + $0xf9] sm:$0xff] %vm169_vm0, %v244_v23  ;;  %280 = vst.msk [vmem:[#allocation2 + $0x121] sm:$0xff] %vm169_vm0, %v247_v24  ;;  %v2821_v38 = vld [vmem:[#allocation2 + $0x51] sm:$0xff]  ;;  %v332_v40 = vld [vmem:[#allocation2 + $0x79] sm:$0xff] }
  0x3c   : > { %279 = vst.msk [vmem:[#allocation2 + $0x111] sm:$0xff] %vm169_vm0, %v246_v28  ;;  %282 = vst.msk [vmem:[#allocation2 + $0x139] sm:$0xff] %vm169_vm0, %v249_v29  ;;  %v331_v41 = vld [vmem:[#allocation2 + $0x69] sm:$0xff]  ;;  %v334_v42 = vld [vmem:[#allocation2 + $0x91] sm:$0xff] }
  0x3d   : > { %617 = vrot.lane.b32.xlu1 %v2795_v27, %s2602_s29  ;;  %623 = vrot.lane.b32.xlu0 %v2803_v30, %s2602_s29  ;;  %281 = vst.msk [vmem:[#allocation2 + $0x129] sm:$0xff] %vm169_vm0, %v248_v33  ;;  %284 = vst.msk [vmem:[#allocation2 + $0x151] sm:$0xff] %vm169_vm0, %v251_v34  ;;  %v333_v43 = vld [vmem:[#allocation2 + $0x81] sm:$0xff]  ;;  %v336_v44 = vld [vmem:[#allocation2 + $0xa9] sm:$0xff] }
  0x3e   : > { %283 = vst.msk [vmem:[#allocation2 + $0x141] sm:$0xff] %vm169_vm0, %v250_v35  ;;  %286 = vst.msk [vmem:[#allocation2 + $0x169] sm:$0xff] %vm169_vm0, %v253_v36  ;;  %v335_v45 = vld [vmem:[#allocation2 + $0x99] sm:$0xff]  ;;  %v338_v46 = vld [vmem:[#allocation2 + $0xc1] sm:$0xff] }
  0x3f   : > { %285 = vst.msk [vmem:[#allocation2 + $0x159] sm:$0xff] %vm169_vm0, %v252_v37  ;;  %287 = vst.msk [vmem:[#allocation2 + $0x171] sm:$0xff] %vm169_vm0, %v254_v39  ;;  %v337_v47 = vld [vmem:[#allocation2 + $0xb1] sm:$0xff]  ;;  %v2837_v48 = vld [vmem:[#allocation2 + $0xd9] sm:$0xff] }
  0x40   : > { %v339_v49 = vld [vmem:[#allocation2 + $0xc9] sm:$0xff]  ;;  %v2842_v50 = vld [vmem:[#allocation2 + $0xf1] sm:$0xff]  ;;  %288 = vst.msk [vmem:[#allocation2 + $0x181] sm:$0xff] %vm169_vm0, %v255_v58  ;;  %289 = vst.msk [vmem:[#allocation2 + $0x189] sm:$0xff] %vm169_vm0, %v256_v62 }
  0x41   : > { %621 = vrot.lane.b32.xlu1 %v2807_v31, %s2602_s29  ;;  %627 = vrot.lane.b32.xlu0 %v330_v32, %s2602_s29  ;;  %v2845_v51 = vld [vmem:[#allocation2 + $0xe1] sm:$0xff]  ;;  %v2849_v52 = vld [vmem:[#allocation2 + $0x109] sm:$0xff]  ;;  %v2886_v4 = vld [vmem:[#allocation2 + $0x32] sm:$0xff] }
  0x42   : > { %v2853_v53 = vld [vmem:[#allocation2 + $0xf9] sm:$0xff]  ;;  %v2857_v54 = vld [vmem:[#allocation2 + $0x121] sm:$0xff]  ;;  %v2893_v6 = vld [vmem:[#allocation2 + $0x4a] sm:$0xff] }
  0x43   : > { %v2861_v55 = vld [vmem:[#allocation2 + $0x111] sm:$0xff]  ;;  %v348_v56 = vld [vmem:[#allocation2 + $0x139] sm:$0xff]  ;;  %v2889_v5 = vld [vmem:[#allocation2 + $0x22] sm:$0xff] }
  0x44   : > { %v2867_v57 = vld [vmem:[#allocation2 + $0x129] sm:$0xff]  ;;  %v350_v59 = vld [vmem:[#allocation2 + $0x151] sm:$0xff]  ;;  %v2881_v2 = vld [vmem:[#allocation2 + $0x1a] sm:$0xff] }
  0x45   : > { %625 = vrot.lane.b32.xlu1 %v2821_v38, %s2602_s29  ;;  %631 = vrot.lane.b32.xlu0 %v332_v40, %s2602_s29  ;;  %v349_v60 = vld [vmem:[#allocation2 + $0x141] sm:$0xff]  ;;  %v352_v61 = vld [vmem:[#allocation2 + $0x169] sm:$0xff]  ;;  %v2905_v9 = vld [vmem:[#allocation2 + $0x52] sm:$0xff] }
  0x46   : > { %v351_v63 = vld [vmem:[#allocation2 + $0x159] sm:$0xff]  ;;  %v353_v1 = vld [vmem:[#allocation2 + $0x171] sm:$0xff]  ;;  %v2901_v8 = vld [vmem:[#allocation2 + $0x62] sm:$0xff] }
  0x47   : > { %v2897_v7 = vld [vmem:[#allocation2 + $0x3a] sm:$0xff]  ;;  %v2911_v11 = vld [vmem:[#allocation2 + $0x6a] sm:$0xff]  ;;  %v366_v12 = vld [vmem:[#allocation2 + $0x92] sm:$0xff] }
  0x48   : > { %v364_v10 = vld [vmem:[#allocation2 + $0x7a] sm:$0xff]  ;;  %v365_v13 = vld [vmem:[#allocation2 + $0x82] sm:$0xff]  ;;  %v368_v14 = vld [vmem:[#allocation2 + $0xaa] sm:$0xff] }
  0x49   : > { %629 = vrot.lane.b32.xlu1 %v331_v41, %s2602_s29  ;;  %635 = vrot.lane.b32.xlu0 %v334_v42, %s2602_s29  ;;  %v367_v15 = vld [vmem:[#allocation2 + $0x9a] sm:$0xff]  ;;  %v370_v16 = vld [vmem:[#allocation2 + $0xc2] sm:$0xff]  ;;  %v369_v17 = vld [vmem:[#allocation2 + $0xb2] sm:$0xff] }
  0x4a   : > { %v2921_v18 = vld [vmem:[#allocation2 + $0xda] sm:$0xff]  ;;  %v371_v19 = vld [vmem:[#allocation2 + $0xca] sm:$0xff]  ;;  %v2926_v20 = vld [vmem:[#allocation2 + $0xf2] sm:$0xff] }
  0x4b   : > { %v2929_v21 = vld [vmem:[#allocation2 + $0xe2] sm:$0xff]  ;;  %v2933_v22 = vld [vmem:[#allocation2 + $0x10a] sm:$0xff]  ;;  %v2937_v23 = vld [vmem:[#allocation2 + $0xfa] sm:$0xff] }
  0x4c   : > { %v2941_v24 = vld [vmem:[#allocation2 + $0x122] sm:$0xff]  ;;  %v2945_v28 = vld [vmem:[#allocation2 + $0x112] sm:$0xff]  ;;  %v380_v29 = vld [vmem:[#allocation2 + $0x13a] sm:$0xff] }
  0x4d   : > { %633 = vrot.lane.b32.xlu1 %v333_v43, %s2602_s29  ;;  %639 = vrot.lane.b32.xlu0 %v336_v44, %s2602_s29  ;;  %v2953_v33 = vld [vmem:[#allocation2 + $0x12a] sm:$0xff]  ;;  %v382_v34 = vld [vmem:[#allocation2 + $0x152] sm:$0xff]  ;;  %v381_v36 = vld [vmem:[#allocation2 + $0x142] sm:$0xff] }
  0x4e   : > { %v384_v39 = vld [vmem:[#allocation2 + $0x16a] sm:$0xff]  ;;  %v383_v41 = vld [vmem:[#allocation2 + $0x15a] sm:$0xff] }
  0x4f   : > { %v2972_v44 = vld [vmem:[#allocation2 + $0x18] sm:$0xff]  ;;  %v2987_v58 = vld [vmem:[#allocation2 + $0x20] sm:$0xff] }
  0x50   : > { %4197 = vst [vmem:[#allocation10_spill] sm:$0xff] %v2972_v44  ;;  %4201 = vst [vmem:[#allocation14_spill] sm:$0xff] %v2987_v58  ;;  %v2999_v62 = vld [vmem:[#allocation2 + $0x38] sm:$0xff] }
  0x51   : > { %637 = vrot.lane.b32.xlu1 %v335_v45, %s2602_s29  ;;  %643 = vrot.lane.b32.xlu0 %v338_v46, %s2602_s29  ;;  %v385_v45 = vld [vmem:[#allocation2 + $0x172] sm:$0xff] }
  0x55   : > { %641 = vrot.lane.b32.xlu1 %v337_v47, %s2602_s29  ;;  %647 = vrot.lane.b32.xlu0 %v2837_v48, %s2602_s29 }
  0x59   : > { %645 = vrot.lane.b32.xlu1 %v339_v49, %s2602_s29  ;;  %651 = vrot.lane.b32.xlu0 %v2842_v50, %s2602_s29  ;;  %v2981_v49 = vld [vmem:[#allocation2 + $0x30] sm:$0xff] }
  0x5d   : > { %649 = vrot.lane.b32.xlu1 %v2845_v51, %s2602_s29  ;;  %655 = vrot.lane.b32.xlu0 %v2849_v52, %s2602_s29 }
  0x61   : > { %653 = vrot.lane.b32.xlu1 %v2853_v53, %s2602_s29  ;;  %659 = vrot.lane.b32.xlu0 %v2857_v54, %s2602_s29 }
  0x65   : > { %657 = vrot.lane.b32.xlu1 %v2861_v55, %s2602_s29  ;;  %663 = vrot.lane.b32.xlu0 %v348_v56, %s2602_s29 }
  0x69   : > { %661 = vrot.lane.b32.xlu1 %v2867_v57, %s2602_s29  ;;  %667 = vrot.lane.b32.xlu0 %v350_v59, %s2602_s29 }
  0x6d   : > { %665 = vrot.lane.b32.xlu1 %v349_v60, %s2602_s29  ;;  %671 = vrot.lane.b32.xlu0 %v352_v61, %s2602_s29  ;;  %v2993_v60 = vld [vmem:[#allocation2 + $0x48] sm:$0xff] }
  0x71   : > { %669 = vrot.lane.b32.xlu1 %v351_v63, %s2602_s29  ;;  %739 = vrot.lane.b32.xlu0 %v354_v0, %s2603_s30  ;;  %v3005_v0 = vld [vmem:[#allocation2 + $0x60] sm:$0xff] }
  0x75   : > { %673 = vrot.lane.b32.xlu1 %v353_v1, %s2602_s29  ;;  %743 = vrot.lane.b32.xlu0 %v2881_v2, %s2603_s30  ;;  %s161_s29 = sand.u32 1, %s2591_s13  }
  0x76   : > { %s4140_s16 = scalar_lea.sflag [#allocation4], %s161_s29 }
  0x79   : > { %741 = vrot.lane.b32.xlu1 %v355_v3, %s2603_s30  ;;  %747 = vrot.lane.b32.xlu0 %v2886_v4, %s2603_s30  ;;  %v3011_v3 = vld [vmem:[#allocation2 + $0x50] sm:$0xff] }
  0x7d   : > { %745 = vrot.lane.b32.xlu1 %v2889_v5, %s2603_s30  ;;  %751 = vrot.lane.b32.xlu0 %v2893_v6, %s2603_s30 }
  0x81   : > { %749 = vrot.lane.b32.xlu1 %v2897_v7, %s2603_s30  ;;  %755 = vrot.lane.b32.xlu0 %v2901_v8, %s2603_s30 }
  0x85   : > { %753 = vrot.lane.b32.xlu1 %v2905_v9, %s2603_s30  ;;  %759 = vrot.lane.b32.xlu0 %v364_v10, %s2603_s30 }
  0x89   : > { %757 = vrot.lane.b32.xlu1 %v2911_v11, %s2603_s30  ;;  %763 = vrot.lane.b32.xlu0 %v366_v12, %s2603_s30  ;;  %v3017_v12 = vld [vmem:[#allocation2 + $0x78] sm:$0xff] }
  0x8d   : > { %761 = vrot.lane.b32.xlu1 %v365_v13, %s2603_s30  ;;  %767 = vrot.lane.b32.xlu0 %v368_v14, %s2603_s30  ;;  %v3023_v14 = vld [vmem:[#allocation2 + $0x68] sm:$0xff] }
  0x91   : > { %765 = vrot.lane.b32.xlu1 %v367_v15, %s2603_s30  ;;  %771 = vrot.lane.b32.xlu0 %v370_v16, %s2603_s30  ;;  %v2949_v32 = vpop.permute.xlu0 %611  ;;  %v302_v16 = vld [vmem:[#allocation2 + $0x90] sm:$0xff] }
  0x95   : > { %769 = vrot.lane.b32.xlu1 %v369_v17, %s2603_s30  ;;  %775 = vrot.lane.b32.xlu0 %v2921_v18, %s2603_s30 }
  0x99   : > { %773 = vrot.lane.b32.xlu1 %v371_v19, %s2603_s30  ;;  %779 = vrot.lane.b32.xlu0 %v2926_v20, %s2603_s30  ;;  %v3032_v19 = vld [vmem:[#allocation2 + $0x80] sm:$0xff] }
  0x9d   : > { %777 = vrot.lane.b32.xlu1 %v2929_v21, %s2603_s30  ;;  %783 = vrot.lane.b32.xlu0 %v2933_v22, %s2603_s30 }
  0xa1   : > { %781 = vrot.lane.b32.xlu1 %v2937_v23, %s2603_s30  ;;  %787 = vrot.lane.b32.xlu0 %v2941_v24, %s2603_s30 }
  0xa2   : > { %v2956_v35 = vpop.permute.xlu0 %613 }
  0xa5   : > { %785 = vrot.lane.b32.xlu1 %v2945_v28, %s2603_s30  ;;  %791 = vrot.lane.b32.xlu0 %v380_v29, %s2603_s30 }
  0xa9   : > { %789 = vrot.lane.b32.xlu1 %v2953_v33, %s2603_s30  ;;  %795 = vrot.lane.b32.xlu0 %v382_v34, %s2603_s30  ;;  %v304_v34 = vld [vmem:[#allocation2 + $0xa8] sm:$0xff] }
  0xab   : > { %v2961_v37 = vpop.permute.xlu1 %615  ;;  %v2963_v40 = vpop.permute.xlu0 %619 }
  0xac   : > { %4193 = vst [vmem:[#allocation6_spill] sm:$0xff] %v2961_v37  ;;  %4194 = vst [vmem:[#allocation7_spill] sm:$0xff] %v2963_v40  ;;  %v3119_v40 = vld [vmem:[#allocation2 + $0x140] sm:$0xff] }
  0xad   : > { %793 = vrot.lane.b32.xlu1 %v381_v36, %s2603_s30  ;;  %799 = vrot.lane.b32.xlu0 %v384_v39, %s2603_s30  ;;  %v303_v39 = vld [vmem:[#allocation2 + $0x98] sm:$0xff] }
  0xaf   : > { %v2967_v42 = vpop.permute.xlu1 %617  ;;  %v2969_v43 = vpop.permute.xlu0 %623 }
  0xb0   : > { %4195 = vst [vmem:[#allocation8_spill] sm:$0xff] %v2967_v42  ;;  %4196 = vst [vmem:[#allocation9_spill] sm:$0xff] %v2969_v43  ;;  %v3095_v43 = vld [vmem:[#allocation2 + $0x110] sm:$0xff]  ;;  %v416_v42 = vld [vmem:[#allocation2 + $0x180] sm:$0xff] }
  0xb1   : > { %797 = vrot.lane.b32.xlu1 %v383_v41, %s2603_s30  ;;  %867 = vrot.lane.b32.xlu0 %v2972_v44, %s2604_s4 }
  0xb3   : > { %v2976_v46 = vpop.permute.xlu1 %621  ;;  %v2978_v47 = vpop.permute.xlu0 %627 }
  0xb4   : > { %4198 = vst [vmem:[#allocation11_spill] sm:$0xff] %v2976_v46  ;;  %4199 = vst [vmem:[#allocation12_spill] sm:$0xff] %v2978_v47  ;;  %v3077_v47 = vld [vmem:[#allocation2 + $0x108] sm:$0xff] }
  0xb5   : > { %801 = vrot.lane.b32.xlu1 %v385_v45, %s2603_s30  ;;  %871 = vrot.lane.b32.xlu0 %v2981_v49, %s2604_s4  ;;  %v3044_v45 = vld [vmem:[#allocation2 + $0xc0] sm:$0xff]  ;;  %4218 = vst [vmem:[#allocation31_spill] sm:$0xff] %v3077_v47  ;;  %v3107_v46 = vld [vmem:[#allocation2 + $0x128] sm:$0xff] }
  0xb7   : > { %v2985_v56 = vpop.permute.xlu1 %625  ;;  %v2989_v59 = vpop.permute.xlu0 %631 }
  0xb8   : > { %4200 = vst [vmem:[#allocation13_spill] sm:$0xff] %v2985_v56  ;;  %4202 = vst [vmem:[#allocation15_spill] sm:$0xff] %v2989_v59  ;;  %v3071_v59 = vld [vmem:[#allocation2 + $0xe0] sm:$0xff]  ;;  %v3083_v56 = vld [vmem:[#allocation2 + $0xf8] sm:$0xff] }
  0xb9   : > { %869 = vrot.lane.b32.xlu1 %v2987_v58, %s2604_s4  ;;  %875 = vrot.lane.b32.xlu0 %v2993_v60, %s2604_s4  ;;  %4216 = vst [vmem:[#allocation29_spill] sm:$0xff] %v3071_v59  ;;  %v3128_v58 = vld [vmem:[#allocation2 + $0x158] sm:$0xff] }
  0xbb   : > { %v2997_v61 = vpop.permute.xlu1 %629  ;;  %v3001_v63 = vpop.permute.xlu0 %635 }
  0xbc   : > { %4203 = vst [vmem:[#allocation16_spill] sm:$0xff] %v2997_v61  ;;  %4204 = vst [vmem:[#allocation17_spill] sm:$0xff] %v3001_v63 }
  0xbd   : > { %873 = vrot.lane.b32.xlu1 %v2999_v62, %s2604_s4  ;;  %879 = vrot.lane.b32.xlu0 %v3005_v0, %s2604_s4 }
  0xbf   : > { %v3009_v1 = vpop.permute.xlu1 %633  ;;  %v3013_v10 = vpop.permute.xlu0 %639 }
  0xc0   : > { %4205 = vst [vmem:[#allocation18_spill] sm:$0xff] %v3009_v1  ;;  %4206 = vst [vmem:[#allocation19_spill] sm:$0xff] %v3013_v10  ;;  %v3065_v1 = vld [vmem:[#allocation2 + $0xf0] sm:$0xff] }
  0xc1   : > { %877 = vrot.lane.b32.xlu1 %v3011_v3, %s2604_s4  ;;  %883 = vrot.lane.b32.xlu0 %v3017_v12, %s2604_s4 }
  0xc3   : > { %v3021_v13 = vpop.permute.xlu1 %637  ;;  %v3025_v15 = vpop.permute.xlu0 %643 }
  0xc4   : > { %4207 = vst [vmem:[#allocation20_spill] sm:$0xff] %v3021_v13 }
  0xc5   : > { %881 = vrot.lane.b32.xlu1 %v3023_v14, %s2604_s4  ;;  %887 = vrot.lane.b32.xlu0 %v302_v16, %s2604_s4 }
  0xc7   : > { %v3030_v17 = vpop.permute.xlu1 %641  ;;  %v3034_v29 = vpop.permute.xlu0 %647 }
  0xc8   : > { %4208 = vst [vmem:[#allocation21_spill] sm:$0xff] %v3030_v17  ;;  %v305_v17 = vld [vmem:[#allocation2 + $0xb0] sm:$0xff] }
  0xc9   : > { %885 = vrot.lane.b32.xlu1 %v3032_v19, %s2604_s4  ;;  %891 = vrot.lane.b32.xlu0 %v304_v34, %s2604_s4  ;;  %v3053_v34 = vld [vmem:[#allocation2 + $0xd8] sm:$0xff] }
  0xca   : > { %4212 = vst [vmem:[#allocation25_spill] sm:$0xff] %v3053_v34 }
  0xcb   : > { %v3039_v36 = vpop.permute.xlu1 %645  ;;  %v3041_v41 = vpop.permute.xlu0 %651 }
  0xcc   : > { %4209 = vst [vmem:[#allocation22_spill] sm:$0xff] %v3041_v41 }
  0xcd   : > { %889 = vrot.lane.b32.xlu1 %v303_v39, %s2604_s4  ;;  %895 = vrot.lane.b32.xlu0 %v3044_v45, %s2604_s4  ;;  %v3059_v39 = vld [vmem:[#allocation2 + $0xc8] sm:$0xff] }
  0xcf   : > { %v3048_v16 = vpop.permute.xlu1 %649  ;;  %v3050_v10 = vpop.permute.xlu0 %655 }
  0xd0   : > { %4210 = vst [vmem:[#allocation23_spill] sm:$0xff] %v3048_v16  ;;  %4211 = vst [vmem:[#allocation24_spill] sm:$0xff] %v3050_v10 }
  0xd1   : > { %893 = vrot.lane.b32.xlu1 %v305_v17, %s2604_s4  ;;  %899 = vrot.lane.b32.xlu0 %v3053_v34, %s2604_s4 }
  0xd3   : > { %v3057_v13 = vpop.permute.xlu1 %653  ;;  %v3061_v63 = vpop.permute.xlu0 %659 }
  0xd4   : > { %4213 = vst [vmem:[#allocation26_spill] sm:$0xff] %v3057_v13  ;;  %4214 = vst [vmem:[#allocation27_spill] sm:$0xff] %v3061_v63 }
  0xd5   : > { %897 = vrot.lane.b32.xlu1 %v3059_v39, %s2604_s4  ;;  %903 = vrot.lane.b32.xlu0 %v3065_v1, %s2604_s4 }
  0xd7   : > { %v3069_v17 = vpop.permute.xlu1 %657  ;;  %v3073_v61 = vpop.permute.xlu0 %663 }
  0xd8   : > { %4215 = vst [vmem:[#allocation28_spill] sm:$0xff] %v3069_v17  ;;  %4217 = vst [vmem:[#allocation30_spill] sm:$0xff] %v3073_v61  ;;  %v3089_v17 = vld [vmem:[#allocation2 + $0x120] sm:$0xff] }
  0xd9   : > { %901 = vrot.lane.b32.xlu1 %v3071_v59, %s2604_s4  ;;  %907 = vrot.lane.b32.xlu0 %v3077_v47, %s2604_s4 }
  0xdb   : > { %v3081_v63 = vpop.permute.xlu1 %661  ;;  %v3085_v10 = vpop.permute.xlu0 %667 }
  0xdc   : > { %4219 = vst [vmem:[#allocation32_spill] sm:$0xff] %v3081_v63  ;;  %4220 = vst [vmem:[#allocation33_spill] sm:$0xff] %v3085_v10  ;;  %v3101_v63 = vld [vmem:[#allocation2 + $0x138] sm:$0xff] }
  0xdd   : > { %905 = vrot.lane.b32.xlu1 %v3083_v56, %s2604_s4  ;;  %911 = vrot.lane.b32.xlu0 %v3089_v17, %s2604_s4 }
  0xdf   : > { %v3093_v61 = vpop.permute.xlu1 %665  ;;  %v3097_v13 = vpop.permute.xlu0 %671 }
  0xe0   : > { %4221 = vst [vmem:[#allocation34_spill] sm:$0xff] %v3093_v61  ;;  %4222 = vst [vmem:[#allocation35_spill] sm:$0xff] %v3097_v13  ;;  %v3113_v61 = vld [vmem:[#allocation2 + $0x150] sm:$0xff] }
  0xe1   : > { %909 = vrot.lane.b32.xlu1 %v3095_v43, %s2604_s4  ;;  %915 = vrot.lane.b32.xlu0 %v3101_v63, %s2604_s4 }
  0xe3   : > { %v3105_v10 = vpop.permute.xlu1 %669  ;;  %v3109_v41 = vpop.permute.xlu0 %739 }
  0xe4   : > { %4223 = vst [vmem:[#allocation36_spill] sm:$0xff] %v3105_v10  ;;  %v320_v10 = vld [vmem:[#allocation2 + $0x168] sm:$0xff] }
  0xe5   : > { %913 = vrot.lane.b32.xlu1 %v3107_v46, %s2604_s4  ;;  %919 = vrot.lane.b32.xlu0 %v3113_v61, %s2604_s4 }
  0xe7   : > { %v3117_v13 = vpop.permute.xlu1 %673  ;;  %v3121_v59 = vpop.permute.xlu0 %743 }
  0xe8   : > { %4224 = vst [vmem:[#allocation37_spill] sm:$0xff] %v3117_v13  ;;  %4225 = vst [vmem:[#allocation38_spill] sm:$0xff] %v3121_v59  ;;  %v321_v59 = vld [vmem:[#allocation2 + $0x170] sm:$0xff] }
  0xe9   : > { %917 = vrot.lane.b32.xlu1 %v3119_v40, %s2604_s4  ;;  %923 = vrot.lane.b32.xlu0 %v320_v10, %s2604_s4  ;;  %v417_v10 = vld [vmem:[#allocation2 + $0x188] sm:$0xff] }
  0xeb   : > { %v3126_v16 = vpop.permute.xlu1 %741  ;;  %v3130_v44 = vpop.permute.xlu0 %747 }
  0xec   : > { %4226 = vst [vmem:[#allocation39_spill] sm:$0xff] %v3130_v44 }
  0xed   : > { %921 = vrot.lane.b32.xlu1 %v3128_v58, %s2604_s4  ;;  %927 = vrot.lane.b32.xlu0 %v416_v42, %s2604_s4 }
  0xef   : > { %v3135_v13 = vpop.permute.xlu1 %745  ;;  %v3137_v37 = vpop.permute.xlu0 %751 }
  0xf0   : > { %4227 = vst [vmem:[#allocation40_spill] sm:$0xff] %v3135_v13 }
  0xf1   : > { %925 = vrot.lane.b32.xlu1 %v321_v59, %s2604_s4  ;;  %995 = vrot.lane.b32.xlu0 %v2786_v25, %s2605_s5 }
  0xf3   : > { %v3142_v34 = vpop.permute.xlu1 %749  ;;  %v3144_v44 = vpop.permute.xlu0 %755 }
  0xf4   : > { %4228 = vst [vmem:[#allocation41_spill] sm:$0xff] %v3144_v44 }
  0xf5   : > { %929 = vrot.lane.b32.xlu1 %v417_v10, %s2604_s4  ;;  %999 = vrot.lane.b32.xlu0 %v2788_v26, %s2605_s5  ;;  %s2316_s4 = sshll.u32 %s161_s29, 8 }
  0xf7   : > { %v3149_v42 = vpop.permute.xlu1 %753  ;;  %v3151_v13 = vpop.permute.xlu0 %759 }
  0xf8   : > { %4229 = vst [vmem:[#allocation42_spill] sm:$0xff] %v3149_v42  ;;  %4230 = vst [vmem:[#allocation43_spill] sm:$0xff] %v3151_v13  ;;  %v1869_v13 = vld [vmem:[%s4183_s1 + $0x18] sm:$0xff] }
  0xf9   : > { %997 = vrot.lane.b32.xlu1 %v2795_v27, %s2605_s5  ;;  %1003 = vrot.lane.b32.xlu0 %v2803_v30, %s2605_s5 }
  0xfb   : > { %v3157_v25 = vpop.permute.xlu1 %757  ;;  %v3159_v59 = vpop.permute.xlu0 %763 }
  0xfc   : > { %4231 = vst [vmem:[#allocation44_spill] sm:$0xff] %v3157_v25  ;;  %4232 = vst [vmem:[#allocation45_spill] sm:$0xff] %v3159_v59 }
  0xfd   : > { %1001 = vrot.lane.b32.xlu1 %v2807_v31, %s2605_s5  ;;  %1027 = vrot.lane.b32.xlu0 %v2837_v48, %s2605_s5 }
  0xff   : > { %v3165_v10 = vpop.permute.xlu1 %761  ;;  %v3167_v44 = vpop.permute.xlu0 %767 }
 0x100   : > { %4233 = vst [vmem:[#allocation46_spill] sm:$0xff] %v3165_v10  ;;  %4234 = vst [vmem:[#allocation47_spill] sm:$0xff] %v3167_v44 }
 0x101   : > { %1005 = vrot.lane.b32.xlu1 %v2821_v38, %s2605_s5  ;;  %1123 = vrot.lane.b32.xlu0 %v2881_v2, %s2606_s6 }
 0x103   : > { %v3173_v27 = vpop.permute.xlu1 %765  ;;  %v3175_v59 = vpop.permute.xlu0 %771 }
 0x104   : > { %4235 = vst [vmem:[#allocation48_spill] sm:$0xff] %v3173_v27 }
 0x105   : > { %1029 = vrot.lane.b32.xlu1 %v2845_v51, %s2605_s5  ;;  %1125 = vrot.lane.b32.xlu0 %v2889_v5, %s2606_s6  ;;  %v1866_v51 = vld [vmem:[%s4183_s1] sm:$0xff]  ;;  %v1867_v5 = vld [vmem:[%s4183_s1 + $0x8] sm:$0xff] }
 0x107   : > { %v3181_v48 = vpop.permute.xlu1 %769  ;;  %v3183_v44 = vpop.permute.xlu0 %775 }
 0x108   : > { %4236 = vst [vmem:[#allocation49_spill] sm:$0xff] %v3181_v48  ;;  %v2455_v48 = vpack.c.bf16 %v1867_v5, %v1866_v51 }
 0x109   : > { %1155 = vrot.lane.b32.xlu1 %v2921_v18, %s2606_s6  ;;  %1251 = vrot.lane.b32.xlu0 %v2981_v49, %s2607_s7 }
 0x10a   : > { %2456 = vmatprep.subr.bf16.mxu0 %v2455_v48  ;;  %2463 = vmatprep.subr.bf16.mxu1 %v2455_v48 }
 0x10b   : > { %v3189_v2 = vpop.permute.xlu1 %773  ;;  %v3191_v27 = vpop.permute.xlu0 %779  ;;  %2458 = vmatpush3.bf16.msra.mxu0 %v2455_v48  ;;  %2466 = vmatpush3.bf16.msra.mxu1 %v2455_v48 }
 0x10d   : > { %1157 = vrot.lane.b32.xlu1 %v2929_v21, %s2606_s6  ;;  %1253 = vrot.lane.b32.xlu0 %v2999_v62, %s2607_s7  ;;  %v1868_v21 = vld [vmem:[%s4183_s1 + $0x10] sm:$0xff] }
 0x10e   : > { %v2459_v5 = vpack.c.bf16 %v1869_v13, %v1868_v21 }
 0x10f   : > { %v3203_v18 = vpop.permute.xlu1 %777  ;;  %v3205_v10 = vpop.permute.xlu0 %783 }
 0x110   : > { %4237 = vst [vmem:[#allocation50_spill] sm:$0xff] %v3205_v10  ;;  %2460 = vmatprep.subr.bf16.mxu0 %v2459_v5  ;;  %2464 = vmatprep.subr.bf16.mxu1 %v2459_v5 }
 0x111   : > { %1283 = vrot.lane.b32.xlu1 %v3065_v1, %s2607_s7  ;;  %1379 = vrot.lane.b32.xlu0 %v2788_v26, %s2608_s25  ;;  %v1870_v26 = vld [vmem:[%s4183_s1 + $0x20] sm:$0xf] }
 0x112   : > { %2462 = vmatpush3.bf16.msra.mxu0 %v2459_v5  ;;  %2467 = vmatpush3.bf16.msra.mxu1 %v2459_v5 }
 0x113   : > { %v3217_v51 = vpop.permute.xlu1 %781  ;;  %v3219_v25 = vpop.permute.xlu0 %787  ;;  %2405 = vmatprep.subr.msk.mxu0 %vm1975_vm2, %v1870_v26  ;;  %2465 = vmatprep.subr.msk.mxu1 %vm1975_vm2, %v1870_v26 }
 0x114   : > { %4238 = vst [vmem:[#allocation51_spill] sm:$0xff] %v3219_v25 }
 0x115   : > { %1285 = vrot.lane.b32.xlu1 %v3083_v56, %s2607_s7  ;;  %1031 = vrot.lane.b32.xlu0 %v2842_v50, %s2605_s5 }
 0x116   : > { %2406 = vmatpush3.msk.msra.mxu0 %vm1975_vm2, %v1870_v26  ;;  %2468 = vmatpush3.msk.msra.mxu1 %vm1975_vm2, %v1870_v26 }
 0x117   : > { %v3225_v42 = vpop.permute.xlu1 %785  ;;  %v3230_v13 = vpop.permute.xlu0 %791 }
 0x118   : > { %4239 = vst [vmem:[#allocation52_spill] sm:$0xff] %v3225_v42  ;;  %4240 = vst [vmem:[#allocation53_spill] sm:$0xff] %v3230_v13  ;;  %v290_v42 = vld [vmem:[#allocation2] sm:$0xff] }
 0x119   : > { %1411 = vrot.lane.b32.xlu1 %v2842_v50, %s2608_s25  ;;  %1413 = vrot.lane.b32.xlu0 %v2853_v53, %s2608_s25 }
 0x11b   : > { %v3236_v48 = vpop.permute.xlu1 %789  ;;  %v3238_v21 = vpop.permute.xlu0 %795 }
 0x11c   : > { %4241 = vst [vmem:[#allocation54_spill] sm:$0xff] %v3236_v48  ;;  %4242 = vst [vmem:[#allocation55_spill] sm:$0xff] %v3238_v21 }
 0x11d   : > { %1381 = vrot.lane.b32.xlu1 %v2807_v31, %s2608_s25  ;;  %1539 = vrot.lane.b32.xlu0 %v2926_v20, %s2609_s28 }
 0x11f   : > { %v3244_v5 = vpop.permute.xlu1 %793  ;;  %v3246_v50 = vpop.permute.xlu0 %799 }
 0x120   : > { %4243 = vst [vmem:[#allocation56_spill] sm:$0xff] %v3244_v5  ;;  %4244 = vst [vmem:[#allocation57_spill] sm:$0xff] %v3246_v50 }
 0x121   : > { %1507 = vrot.lane.b32.xlu1 %v2886_v4, %s2609_s28  ;;  %1127 = vrot.lane.b32.xlu0 %v2886_v4, %s2606_s6 }
 0x123   : > { %v3252_v26 = vpop.permute.xlu1 %797  ;;  %v3254_v21 = vpop.permute.xlu0 %867 }
 0x124   : > { %4245 = vst [vmem:[#allocation58_spill] sm:$0xff] %v3252_v26 }
 0x125   : > { %1033 = vrot.lane.b32.xlu1 %v2853_v53, %s2605_s5  ;;  %1509 = vrot.lane.b32.xlu0 %v2897_v7, %s2609_s28 }
 0x127   : > { %v3260_v31 = vpop.permute.xlu1 %801  ;;  %v3262_v5 = vpop.permute.xlu0 %871 }
 0x128   : > { %4246 = vst [vmem:[#allocation59_spill] sm:$0xff] %v3260_v31 }
 0x129   : > { %1159 = vrot.lane.b32.xlu1 %v2926_v20, %s2606_s6  ;;  %1129 = vrot.lane.b32.xlu0 %v2897_v7, %s2606_s6 }
 0x12b   : > { %v3268_v4 = vpop.permute.xlu1 %869  ;;  %v3270_v50 = vpop.permute.xlu0 %875 }
 0x12d   : > { %1541 = vrot.lane.b32.xlu1 %v2937_v23, %s2609_s28  ;;  %1255 = vrot.lane.b32.xlu0 %v2993_v60, %s2607_s7 }
 0x12f   : > { %v3276_v53 = vpop.permute.xlu1 %873  ;;  %v3278_v31 = vpop.permute.xlu0 %879 }
 0x130   : > { %4247 = vst [vmem:[#allocation60_spill] sm:$0xff] %v3278_v31  ;;  %v538_v31 = vld [vmem:[#allocation2 + $0x141] sm:$0xff] }
 0x131   : > { %1161 = vrot.lane.b32.xlu1 %v2937_v23, %s2606_s6  ;;  %1257 = vrot.lane.b32.xlu0 %v3011_v3, %s2607_s7 }
 0x133   : > { %v3284_v7 = vpop.permute.xlu1 %877  ;;  %v3286_v20 = vpop.permute.xlu0 %883 }
 0x134   : > { %4248 = vst [vmem:[#allocation61_spill] sm:$0xff] %v3286_v20  ;;  %v537_v20 = vld [vmem:[#allocation2 + $0x139] sm:$0xff] }
 0x135   : > { %1287 = vrot.lane.b32.xlu1 %v3077_v47, %s2607_s7  ;;  %1383 = vrot.lane.b32.xlu0 %v2803_v30, %s2608_s25 }
 0x137   : > { %v3292_v60 = vpop.permute.xlu1 %881  ;;  %v3294_v26 = vpop.permute.xlu0 %887 }
 0x138   : > { %4249 = vst [vmem:[#allocation62_spill] sm:$0xff] %v3292_v60  ;;  %4250 = vst [vmem:[#allocation63_spill] sm:$0xff] %v3294_v26 }
 0x139   : > { %1289 = vrot.lane.b32.xlu1 %v3095_v43, %s2607_s7  ;;  %1035 = vrot.lane.b32.xlu0 %v2849_v52, %s2605_s5 }
 0x13b   : > { %v3300_v23 = vpop.permute.xlu1 %885  ;;  %v3302_v3 = vpop.permute.xlu0 %891 }
 0x13c   : > { %4251 = vst [vmem:[#allocation64_spill] sm:$0xff] %v3300_v23  ;;  %4252 = vst [vmem:[#allocation65_spill] sm:$0xff] %v3302_v3 }
 0x13d   : > { %1415 = vrot.lane.b32.xlu1 %v2849_v52, %s2608_s25  ;;  %1417 = vrot.lane.b32.xlu0 %v2861_v55, %s2608_s25 }
 0x13f   : > { %v3308_v30 = vpop.permute.xlu1 %889  ;;  %v3310_v13 = vpop.permute.xlu0 %895 }
 0x140   : > { %4253 = vst [vmem:[#allocation66_spill] sm:$0xff] %v3308_v30  ;;  %4254 = vst [vmem:[#allocation67_spill] sm:$0xff] %v3310_v13 }
 0x141   : > { %1385 = vrot.lane.b32.xlu1 %v2821_v38, %s2608_s25  ;;  %1543 = vrot.lane.b32.xlu0 %v2933_v22, %s2609_s28 }
 0x143   : > { %v3316_v43 = vpop.permute.xlu1 %893  ;;  %v3318_v26 = vpop.permute.xlu0 %899 }
 0x144   : > { %4255 = vst [vmem:[#allocation68_spill] sm:$0xff] %v3316_v43 }
 0x145   : > { %1511 = vrot.lane.b32.xlu1 %v2893_v6, %s2609_s28  ;;  %1131 = vrot.lane.b32.xlu0 %v2893_v6, %s2606_s6 }
 0x147   : > { %v3324_v52 = vpop.permute.xlu1 %897  ;;  %v3326_v3 = vpop.permute.xlu0 %903 }
 0x148   : > { %4256 = vst [vmem:[#allocation69_spill] sm:$0xff] %v3324_v52 }
 0x149   : > { %1037 = vrot.lane.b32.xlu1 %v2861_v55, %s2605_s5  ;;  %1513 = vrot.lane.b32.xlu0 %v2905_v9, %s2609_s28 }
 0x14b   : > { %v3332_v38 = vpop.permute.xlu1 %901  ;;  %v3334_v13 = vpop.permute.xlu0 %907 }
 0x14d   : > { %1163 = vrot.lane.b32.xlu1 %v2933_v22, %s2606_s6  ;;  %1133 = vrot.lane.b32.xlu0 %v2905_v9, %s2606_s6  ;;  %v519_v22 = vld [vmem:[#allocation2 + $0x61] sm:$0xff] }
 0x14f   : > { %v3340_v6 = vpop.permute.xlu1 %905  ;;  %v3342_v52 = vpop.permute.xlu0 %911 }
 0x150   : > { %4257 = vst [vmem:[#allocation70_spill] sm:$0xff] %v3342_v52  ;;  %v1603_v52 = vsel %vm169_vm0, %v290_v42, %v2949_v32  ;;  %v291_v42 = vld [vmem:[#allocation2 + $0x8] sm:$0xff] }
 0x151   : > { %1545 = vrot.lane.b32.xlu1 %v2945_v28, %s2609_s28  ;;  %1259 = vrot.lane.b32.xlu0 %v3005_v0, %s2607_s7 }
 0x153   : > { %v3348_v55 = vpop.permute.xlu1 %909  ;;  %v3350_v43 = vpop.permute.xlu0 %915 }
 0x154   : > { %4258 = vst [vmem:[#allocation71_spill] sm:$0xff] %v3350_v43 }
 0x155   : > { %1165 = vrot.lane.b32.xlu1 %v2945_v28, %s2606_s6  ;;  %1261 = vrot.lane.b32.xlu0 %v3023_v14, %s2607_s7  ;;  %v520_v14 = vld [vmem:[#allocation2 + $0x69] sm:$0xff] }
 0x157   : > { %v3356_v9 = vpop.permute.xlu1 %913  ;;  %v3358_v30 = vpop.permute.xlu0 %919 }
 0x158   : > { %4259 = vst [vmem:[#allocation72_spill] sm:$0xff] %v3356_v9  ;;  %4260 = vst [vmem:[#allocation73_spill] sm:$0xff] %v3358_v30 }
 0x159   : > { %1291 = vrot.lane.b32.xlu1 %v3089_v17, %s2607_s7  ;;  %1387 = vrot.lane.b32.xlu0 %v519_v22, %s2608_s25 }
 0x15b   : > { %v3363_v0 = vpop.permute.xlu1 %917  ;;  %v3365_v48 = vpop.permute.xlu0 %923 }
 0x15c   : > { %4261 = vst [vmem:[#allocation74_spill] sm:$0xff] %v3363_v0  ;;  %4262 = vst [vmem:[#allocation75_spill] sm:$0xff] %v3365_v48 }
 0x15d   : > { %1293 = vrot.lane.b32.xlu1 %v3107_v46, %s2607_s7  ;;  %1007 = vrot.lane.b32.xlu0 %v519_v22, %s2605_s5 }
 0x15f   : > { %v3370_v28 = vpop.permute.xlu1 %921  ;;  %v3372_v23 = vpop.permute.xlu0 %927 }
 0x160   : > { %4263 = vst [vmem:[#allocation76_spill] sm:$0xff] %v3370_v28  ;;  %4264 = vst [vmem:[#allocation77_spill] sm:$0xff] %v3372_v23 }
 0x161   : > { %1419 = vrot.lane.b32.xlu1 %v2857_v54, %s2608_s25  ;;  %1389 = vrot.lane.b32.xlu0 %v520_v14, %s2608_s25 }
 0x163   : > { %v3377_v17 = vpop.permute.xlu1 %925  ;;  %v3379_v30 = vpop.permute.xlu0 %995 }
 0x164   : > { %4265 = vst [vmem:[#allocation78_spill] sm:$0xff] %v3377_v17 }
 0x165   : > { %1039 = vrot.lane.b32.xlu1 %v2857_v54, %s2605_s5  ;;  %1515 = vrot.lane.b32.xlu0 %v2901_v8, %s2609_s28  ;;  %v441_v54 = vld [vmem:[#allocation2 + $0x129] sm:$0xff] }
 0x167   : > { %v3385_v46 = vpop.permute.xlu1 %929  ;;  %v3387_v22 = vpop.permute.xlu0 %999 }
 0x168   : > { %4266 = vst [vmem:[#allocation79_spill] sm:$0xff] %v3385_v46 }
 0x169   : > { %1421 = vrot.lane.b32.xlu1 %v2867_v57, %s2608_s25  ;;  %1009 = vrot.lane.b32.xlu0 %v520_v14, %s2605_s5 }
 0x16b   : > { %v3392_v23 = vpop.permute.xlu1 %997  ;;  %v3394_v17 = vpop.permute.xlu0 %1003 }
 0x16d   : > { %1547 = vrot.lane.b32.xlu1 %v2941_v24, %s2609_s28  ;;  %1135 = vrot.lane.b32.xlu0 %v2901_v8, %s2606_s6 }
 0x16f   : > { %v3400_v48 = vpop.permute.xlu1 %1001  ;;  %v1028_v46 = vpop.permute.xlu0 %1027 }
 0x171   : > { %1041 = vrot.lane.b32.xlu1 %v441_v54, %s2605_s5  ;;  %1517 = vrot.lane.b32.xlu0 %v2911_v11, %s2609_s28 }
 0x173   : > { %v3405_v57 = vpop.permute.xlu1 %1005  ;;  %v1124_v14 = vpop.permute.xlu0 %1123 }
 0x175   : > { %1167 = vrot.lane.b32.xlu1 %v2941_v24, %s2606_s6  ;;  %1137 = vrot.lane.b32.xlu0 %v2911_v11, %s2606_s6  ;;  %v521_v11 = vld [vmem:[#allocation2 + $0x79] sm:$0xff] }
 0x177   : > { %v3411_v28 = vpop.permute.xlu1 %1029  ;;  %v3413_v8 = vpop.permute.xlu0 %1125 }
 0x179   : > { %1549 = vrot.lane.b32.xlu1 %v2953_v33, %s2609_s28  ;;  %1263 = vrot.lane.b32.xlu0 %v3017_v12, %s2607_s7 }
 0x17b   : > { %v1156_v54 = vpop.permute.xlu1 %1155  ;;  %v1252_v0 = vpop.permute.xlu0 %1251 }
 0x17d   : > { %1169 = vrot.lane.b32.xlu1 %v2953_v33, %s2606_s6  ;;  %1265 = vrot.lane.b32.xlu0 %v3032_v19, %s2607_s7  ;;  %v522_v19 = vld [vmem:[#allocation2 + $0x81] sm:$0xff] }
 0x17f   : > { %v3423_v24 = vpop.permute.xlu1 %1157  ;;  %v3425_v43 = vpop.permute.xlu0 %1253 }
 0x181   : > { %1295 = vrot.lane.b32.xlu1 %v3101_v63, %s2607_s7  ;;  %1391 = vrot.lane.b32.xlu0 %v521_v11, %s2608_s25  ;;  %v1619_v63 = vsel %vm169_vm0, %v3044_v45, %v3025_v15  ;;  %v1636_v15 = vsel %vm1635_vm3, %v1603_v52, %v3109_v41 }
 0x183   : > { %v1284_v25 = vpop.permute.xlu1 %1283  ;;  %v1380_v12 = vpop.permute.xlu0 %1379 }
 0x185   : > { %1297 = vrot.lane.b32.xlu1 %v3119_v40, %s2607_s7  ;;  %1011 = vrot.lane.b32.xlu0 %v521_v11, %s2605_s5  ;;  %v1652_v40 = vsel %vm1635_vm3, %v1619_v63, %v3175_v59  ;;  %v553_v11 = vld [vmem:[#allocation2 + $0x7a] sm:$0xff]  ;;  %v1669_v59 = vsel %vm1668_vm4, %v1636_v15, %v3254_v21 }
 0x186   : > { %v1685_v10 = vsel %vm1668_vm4, %v1652_v40, %v3318_v26  ;;  %v1702_v26 = vsel %vm1701_vm5, %v1669_v59, %v3379_v30  ;;  %v1604_v40 = vsel %vm169_vm0, %v291_v42, %v2956_v35 }
 0x187   : > { %v3433_v33 = vpop.permute.xlu1 %1285  ;;  %v3435_v9 = vpop.permute.xlu0 %1031  ;;  %v1718_v45 = vsel %vm1701_vm5, %v1685_v10, %v1028_v46  ;;  %v1735_v10 = vsel %vm1734_vm6, %v1702_v26, %v1124_v14 }
 0x188   : > { %v1751_v63 = vsel %vm1734_vm6, %v1718_v45, %v1156_v54  ;;  %v1768_v52 = vsel %vm1767_vm7, %v1735_v10, %v1252_v0  ;;  %v569_v54 = vld [vmem:[#allocation2 + $0x13a] sm:$0xff]  ;;  %v1620_v45 = vsel %vm169_vm0, %v3059_v39, %v3039_v36 }
 0x189   : > { %1423 = vrot.lane.b32.xlu1 %v537_v20, %s2608_s25  ;;  %1393 = vrot.lane.b32.xlu0 %v522_v19, %s2608_s25  ;;  %v1784_v41 = vsel %vm1767_vm7, %v1751_v63, %v1284_v25  ;;  %v1801_v30 = vsel %vm1800_vm9, %v1768_v52, %v1380_v12  ;;  %v492_v10 = vld [vmem:[#allocation2 + $0x98] sm:$0xff] }
 0x18b   : > { %v1412_v60 = vpop.permute.xlu1 %1411  ;;  %v1414_v47 = vpop.permute.xlu0 %1413 }
 0x18d   : > { %1043 = vrot.lane.b32.xlu1 %v537_v20, %s2605_s5  ;;  %1519 = vrot.lane.b32.xlu0 %v553_v11, %s2609_s28  ;;  %v1817_v20 = vsel %vm1800_vm9, %v1784_v41, %v1412_v60  ;;  %v1637_v60 = vsel %vm1635_vm3, %v1604_v40, %v3126_v16  ;;  %v491_v41 = vld [vmem:[#allocation2 + $0x90] sm:$0xff]  ;;  %v4267_v40 = vld [vmem:[#allocation25_spill] sm:$0xff] }
 0x18e   : > { %v1670_v0 = vsel %vm1668_vm4, %v1637_v60, %v3268_v4  ;;  %v554_v4 = vld [vmem:[#allocation2 + $0x82] sm:$0xff] }
 0x18f   : > { %v1382_v32 = vpop.permute.xlu1 %1381  ;;  %v1540_v21 = vpop.permute.xlu0 %1539  ;;  %v1703_v35 = vsel %vm1701_vm5, %v1670_v0, %v3392_v23  ;;  %v1653_v23 = vsel %vm1635_vm3, %v1620_v45, %v3189_v2  ;;  %v4269_v0 = vld [vmem:[#allocation10_spill] sm:$0xff] }
 0x190   : > { %v1850_v46 = vsel %vm1833_vm8, %v1817_v20, %v1540_v21  ;;  %v1736_v12 = vsel %vm1734_vm6, %v1703_v35, %v3413_v8  ;;  %v523_v20 = vld [vmem:[#allocation2 + $0x91] sm:$0xff] }
 0x191   : > { %1425 = vrot.lane.b32.xlu1 %v538_v31, %s2608_s25  ;;  %1013 = vrot.lane.b32.xlu0 %v522_v19, %s2605_s5  ;;  %v1769_v19 = vsel %vm1767_vm7, %v1736_v12, %v3425_v43 }
 0x192   : > { %2431 = vmatprep.mubr.msk.f32.mxu1 %vm1878_vm10, %v1850_v46  ;;  %v1802_v59 = vsel %vm1800_vm9, %v1769_v19, %v1382_v32  ;;  %v570_v32 = vld [vmem:[#allocation2 + $0x142] sm:$0xff]  ;;  %v4270_v19 = vld [vmem:[#allocation38_spill] sm:$0xff] }
 0x193   : > { %v1508_v25 = vpop.permute.xlu1 %1507  ;;  %v3474_v15 = vpop.permute.xlu0 %1127 }
 0x194   : > { %v1834_v14 = vsel %vm1833_vm8, %v1801_v30, %v1508_v25  ;;  %v1621_v30 = vsel %vm169_vm0, %v4267_v40, %v3034_v29  ;;  %v4274_v40 = vld [vmem:[#allocation23_spill] sm:$0xff] }
 0x195   : > { %1551 = vrot.lane.b32.xlu1 %v569_v54, %s2609_s28  ;;  %2407 = vmatprep.mubr.msk.f32.mxu0 %vm1878_vm10, %v1834_v14  ;;  %v1654_v60 = vsel %vm1635_vm3, %v1621_v30, %v3183_v44  ;;  %v4268_v14 = vld [vmem:[#allocation6_spill] sm:$0xff] }
 0x196   : > { %1139 = vrot.lane.b32.xlu0 %v553_v11, %s2606_s6  ;;  %v1686_v11 = vsel %vm1668_vm4, %v1653_v23, %v3332_v38  ;;  %v1605_v35 = vsel %vm169_vm0, %v4269_v0, %v4268_v14  ;;  %v1687_v12 = vsel %vm1668_vm4, %v1654_v60, %v3326_v3  ;;  %v555_v23 = vld [vmem:[#allocation2 + $0x92] sm:$0xff]  ;;  %v556_v0 = vld [vmem:[#allocation2 + $0x9a] sm:$0xff] }
 0x197   : > { %v3483_v16 = vpop.permute.xlu1 %1033  ;;  %v1510_v63 = vpop.permute.xlu0 %1509  ;;  %v1719_v36 = vsel %vm1701_vm5, %v1686_v11, %v3411_v28  ;;  %v1638_v29 = vsel %vm1635_vm3, %v1605_v35, %v4270_v19 }
 0x198   : > { %v1835_v8 = vsel %vm1833_vm8, %v1802_v59, %v1510_v63  ;;  %v1752_v39 = vsel %vm1734_vm6, %v1719_v36, %v3423_v24  ;;  %v1671_v44 = vsel %vm1668_vm4, %v1638_v29, %v3262_v5  ;;  %v540_v36 = vld [vmem:[#allocation2 + $0x159] sm:$0xff] }
 0x199   : > { %1045 = vrot.lane.b32.xlu1 %v538_v31, %s2605_s5  ;;  %2408 = vmatmul.mubr.msk.f32.vlgmr.msra.gmra.mrb[0].mxu0 %vm1878_vm10, %v1835_v8  ;;  %v1785_v2 = vsel %vm1767_vm7, %v1752_v39, %v3433_v33  ;;  %v1704_v3 = vsel %vm1701_vm5, %v1671_v44, %v3387_v22  ;;  %v4271_v39 = vld [vmem:[#allocation8_spill] sm:$0xff]  ;;  %v493_v44 = vld [vmem:[#allocation2 + $0xa8] sm:$0xff] }
 0x19a   : > { %1521 = vrot.lane.b32.xlu0 %v554_v4, %s2609_s28  ;;  %v1818_v38 = vsel %vm1800_vm9, %v1785_v2, %v1414_v47  ;;  %v1737_v8 = vsel %vm1734_vm6, %v1704_v3, %v3474_v15  ;;  %v4272_v2 = vld [vmem:[#allocation14_spill] sm:$0xff]  ;;  %v509_v3 = vld [vmem:[#allocation2 + $0x168] sm:$0xff] }
 0x19b   : > { %v1160_v43 = vpop.permute.xlu1 %1159  ;;  %v3503_v31 = vpop.permute.xlu0 %1129  ;;  %v1606_v22 = vsel %vm169_vm0, %v4272_v2, %v4271_v39 }
 0x19d   : > { %1171 = vrot.lane.b32.xlu1 %v569_v54, %s2606_s6  ;;  %v539_v54 = vld [vmem:[#allocation2 + $0x151] sm:$0xff] }
 0x19e   : > { %1141 = vrot.lane.b32.xlu0 %v554_v4, %s2606_s6  ;;  %v1720_v4 = vsel %vm1701_vm5, %v1687_v12, %v3435_v9 }
 0x19f   : > { %v1542_v42 = vpop.permute.xlu1 %1541  ;;  %v1256_v28 = vpop.permute.xlu0 %1255  ;;  %v1753_v45 = vsel %vm1734_vm6, %v1720_v4, %v1160_v43 }
 0x1a0   : > { %v1851_v26 = vsel %vm1833_vm8, %v1818_v38, %v1542_v42  ;;  %v1770_v5 = vsel %vm1767_vm7, %v1737_v8, %v1256_v28  ;;  %v4273_v38 = vld [vmem:[#allocation40_spill] sm:$0xff] }
 0x1a1   : > { %1553 = vrot.lane.b32.xlu1 %v570_v32, %s2609_s28  ;;  %2432 = vmatmul.mubr.msk.f32.vlgmr.msra.gmra.mrb[0].mxu1 %vm1878_vm10, %v1851_v26  ;;  %v1639_v42 = vsel %vm1635_vm3, %v1606_v22, %v4273_v38 }
 0x1a2   : > { %1267 = vrot.lane.b32.xlu0 %v491_v41, %s2607_s7  ;;  %v1672_v41 = vsel %vm1668_vm4, %v1639_v42, %v3276_v53  ;;  %v4275_v53 = vld [vmem:[#allocation29_spill] sm:$0xff] }
 0x1a3   : > { %v3514_v24 = vpop.permute.xlu1 %1161  ;;  %v1258_v33 = vpop.permute.xlu0 %1257  ;;  %v1622_v30 = vsel %vm169_vm0, %v4275_v53, %v4274_v40  ;;  %v557_v40 = vld [vmem:[#allocation2 + $0xaa] sm:$0xff] }
 0x1a5   : > { %1173 = vrot.lane.b32.xlu1 %v570_v32, %s2606_s6 }
 0x1a6   : > { %1269 = vrot.lane.b32.xlu0 %v492_v10, %s2607_s7  ;;  %v1705_v10 = vsel %vm1701_vm5, %v1672_v41, %v3400_v48  ;;  %v1655_v48 = vsel %vm1635_vm3, %v1622_v30, %v3203_v18  ;;  %v4278_v41 = vld [vmem:[#allocation22_spill] sm:$0xff] }
 0x1a7   : > { %v1288_v47 = vpop.permute.xlu1 %1287  ;;  %v1384_v21 = vpop.permute.xlu0 %1383 }
 0x1a8   : > { %v1786_v63 = vsel %vm1767_vm7, %v1753_v45, %v1288_v47  ;;  %v1803_v32 = vsel %vm1800_vm9, %v1770_v5, %v1384_v21  ;;  %v571_v47 = vld [vmem:[#allocation2 + $0x152] sm:$0xff] }
 0x1a9   : > { %1299 = vrot.lane.b32.xlu1 %v3113_v61, %s2607_s7  ;;  %v524_v61 = vld [vmem:[#allocation2 + $0x99] sm:$0xff] }
 0x1aa   : > { %1395 = vrot.lane.b32.xlu0 %v523_v20, %s2608_s25 }
 0x1ab   : > { %v1290_v52 = vpop.permute.xlu1 %1289  ;;  %v3521_v46 = vpop.permute.xlu0 %1035 }
 0x1ad   : > { %1301 = vrot.lane.b32.xlu1 %v3128_v58, %s2607_s7 }
 0x1ae   : > { %1015 = vrot.lane.b32.xlu0 %v523_v20, %s2605_s5  ;;  %v1738_v20 = vsel %vm1734_vm6, %v1705_v10, %v3503_v31 }
 0x1af   : > { %v1416_v25 = vpop.permute.xlu1 %1415  ;;  %v1418_v58 = vpop.permute.xlu0 %1417 }
 0x1b0   : > { %v1819_v11 = vsel %vm1800_vm9, %v1786_v63, %v1416_v25 }
 0x1b1   : > { %1427 = vrot.lane.b32.xlu1 %v539_v54, %s2608_s25 }
 0x1b2   : > { %1397 = vrot.lane.b32.xlu0 %v524_v61, %s2608_s25 }
 0x1b3   : > { %v1386_v59 = vpop.permute.xlu1 %1385  ;;  %v1544_v9 = vpop.permute.xlu0 %1543 }
 0x1b4   : > { %v1852_v43 = vsel %vm1833_vm8, %v1819_v11, %v1544_v9  ;;  %v510_v11 = vld [vmem:[#allocation2 + $0x170] sm:$0xff]  ;;  %v4276_v9 = vld [vmem:[#allocation7_spill] sm:$0xff] }
 0x1b5   : > { %1047 = vrot.lane.b32.xlu1 %v539_v54, %s2605_s5  ;;  %2434 = vmatprep.mubr.msk.f32.mxu1 %vm1878_vm10, %v1852_v43  ;;  %v1771_v54 = vsel %vm1767_vm7, %v1738_v20, %v1258_v33  ;;  %v1607_v5 = vsel %vm169_vm0, %v2981_v49, %v4276_v9  ;;  %v496_v9 = vld [vmem:[#allocation2 + $0xc8] sm:$0xff] }
 0x1b6   : > { %1523 = vrot.lane.b32.xlu0 %v555_v23, %s2609_s28  ;;  %v1804_v25 = vsel %vm1800_vm9, %v1771_v54, %v1386_v59 }
 0x1b7   : > { %v1512_v15 = vpop.permute.xlu1 %1511  ;;  %v1132_v28 = vpop.permute.xlu0 %1131 }
 0x1b8   : > { %v1836_v26 = vsel %vm1833_vm8, %v1803_v32, %v1512_v15  ;;  %v541_v15 = vld [vmem:[#allocation2 + $0x169] sm:$0xff] }
 0x1b9   : > { %1429 = vrot.lane.b32.xlu1 %v540_v36, %s2608_s25  ;;  %2410 = vmatprep.mubr.msk.f32.mxu0 %vm1878_vm10, %v1836_v26  ;;  %v526_v26 = vld [vmem:[#allocation2 + $0xb1] sm:$0xff] }
 0x1ba   : > { %1017 = vrot.lane.b32.xlu0 %v524_v61, %s2605_s5  ;;  %v1688_v61 = vsel %vm1668_vm4, %v1655_v48, %v3340_v6 }
 0x1bb   : > { %v3572_v21 = vpop.permute.xlu1 %1037  ;;  %v1514_v60 = vpop.permute.xlu0 %1513  ;;  %v1721_v14 = vsel %vm1701_vm5, %v1688_v61, %v3483_v16  ;;  %v572_v16 = vld [vmem:[#allocation2 + $0x15a] sm:$0xff] }
 0x1bc   : > { %v1837_v31 = vsel %vm1833_vm8, %v1804_v25, %v1514_v60  ;;  %v1754_v35 = vsel %vm1734_vm6, %v1721_v14, %v3514_v24  ;;  %v542_v25 = vld [vmem:[#allocation2 + $0x171] sm:$0xff] }
 0x1bd   : > { %1555 = vrot.lane.b32.xlu1 %v571_v47, %s2609_s28  ;;  %2411 = vmatmul.mubr.msk.f32.gmra.mrb[2].mxu0 %vm1878_vm10, %v1837_v31  ;;  %v1787_v18 = vsel %vm1767_vm7, %v1754_v35, %v1290_v52  ;;  %v4279_v60 = vld [vmem:[#allocation11_spill] sm:$0xff] }
 0x1be   : > { %1143 = vrot.lane.b32.xlu0 %v555_v23, %s2606_s6  ;;  %v1820_v6 = vsel %vm1800_vm9, %v1787_v18, %v1418_v58  ;;  %v494_v58 = vld [vmem:[#allocation2 + $0xb0] sm:$0xff] }
 0x1bf   : > { %v1164_v33 = vpop.permute.xlu1 %1163  ;;  %v3591_v12 = vpop.permute.xlu0 %1133  ;;  %v525_v23 = vld [vmem:[#allocation2 + $0xa9] sm:$0xff] }
 0x1c1   : > { %1049 = vrot.lane.b32.xlu1 %v540_v36, %s2605_s5  ;;  %v4277_v36 = vld [vmem:[#allocation39_spill] sm:$0xff] }
 0x1c2   : > { %1525 = vrot.lane.b32.xlu0 %v556_v0, %s2609_s28  ;;  %v1640_v39 = vsel %vm1635_vm3, %v1607_v5, %v4277_v36 }
 0x1c3   : > { %v1546_v19 = vpop.permute.xlu1 %1545  ;;  %v1260_v4 = vpop.permute.xlu0 %1259  ;;  %v1673_v2 = vsel %vm1668_vm4, %v1640_v39, %v3270_v50  ;;  %v1623_v50 = vsel %vm169_vm0, %v3065_v1, %v4278_v41  ;;  %v527_v39 = vld [vmem:[#allocation2 + $0xc1] sm:$0xff] }
 0x1c4   : > { %v1853_v29 = vsel %vm1833_vm8, %v1820_v6, %v1546_v19  ;;  %v1706_v32 = vsel %vm1701_vm5, %v1673_v2, %v3394_v17  ;;  %v1656_v17 = vsel %vm1635_vm3, %v1623_v50, %v3191_v27  ;;  %v4280_v6 = vld [vmem:[#allocation26_spill] sm:$0xff]  ;;  %v4282_v41 = vld [vmem:[#allocation60_spill] sm:$0xff] }
 0x1c5   : > { %1175 = vrot.lane.b32.xlu1 %v571_v47, %s2606_s6  ;;  %2435 = vmatmul.mubr.msk.f32.gmra.mrb[2].mxu1 %vm1878_vm10, %v1853_v29  ;;  %v1739_v38 = vsel %vm1734_vm6, %v1706_v32, %v1132_v28  ;;  %v1689_v20 = vsel %vm1668_vm4, %v1656_v17, %v3334_v13  ;;  %v1608_v13 = vsel %vm169_vm0, %v2999_v62, %v4279_v60  ;;  %v2518_v32 = vld [vmem:[#allocation2 + $0x48] sm:$0xff] }
 0x1c6   : > { %1145 = vrot.lane.b32.xlu0 %v556_v0, %s2606_s6  ;;  %v1772_v42 = vsel %vm1767_vm7, %v1739_v38, %v1260_v4  ;;  %v1722_v1 = vsel %vm1701_vm5, %v1689_v20, %v3521_v46  ;;  %v1641_v46 = vsel %vm1635_vm3, %v1608_v13, %v3142_v34  ;;  %v573_v0 = vld [vmem:[#allocation2 + $0x16a] sm:$0xff]  ;;  %v543_v17 = vld [vmem:[#allocation2 + $0x181] sm:$0xff] }
 0x1c7   : > { %v3601_v24 = vpop.permute.xlu1 %1165  ;;  %v1262_v45 = vpop.permute.xlu0 %1261  ;;  %v1755_v53 = vsel %vm1734_vm6, %v1722_v1, %v1164_v33  ;;  %v1674_v33 = vsel %vm1668_vm4, %v1641_v46, %v3284_v7  ;;  %v1624_v7 = vsel %vm169_vm0, %v3083_v56, %v4280_v6  ;;  %v528_v1 = vld [vmem:[#allocation2 + $0xc9] sm:$0xff] }
 0x1c8   : > { %v1707_v62 = vsel %vm1701_vm5, %v1674_v33, %v3405_v57  ;;  %v1657_v57 = vsel %vm1635_vm3, %v1624_v7, %v3217_v51  ;;  %v559_v33 = vld [vmem:[#allocation2 + $0xc2] sm:$0xff] }
 0x1c9   : > { %1557 = vrot.lane.b32.xlu1 %v572_v16, %s2609_s28  ;;  %v1740_v35 = vsel %vm1734_vm6, %v1707_v62, %v3591_v12  ;;  %v1690_v4 = vsel %vm1668_vm4, %v1657_v57, %v3348_v55  ;;  %v4287_v6 = vld [vmem:[#allocation13_spill] sm:$0xff] }
 0x1ca   : > { %1271 = vrot.lane.b32.xlu0 %v493_v44, %s2607_s7  ;;  %v1773_v18 = vsel %vm1767_vm7, %v1740_v35, %v1262_v45  ;;  %v1723_v56 = vsel %vm1701_vm5, %v1690_v4, %v3572_v21  ;;  %v558_v44 = vld [vmem:[#allocation2 + $0xb2] sm:$0xff]  ;;  %v544_v35 = vld [vmem:[#allocation2 + $0x189] sm:$0xff] }
 0x1cb   : > { %v1292_v52 = vpop.permute.xlu1 %1291  ;;  %v1388_v59 = vpop.permute.xlu0 %1387  ;;  %v1756_v45 = vsel %vm1734_vm6, %v1723_v56, %v3601_v24  ;;  %v574_v21 = vld [vmem:[#allocation2 + $0x172] sm:$0xff] }
 0x1cc   : > { %v1805_v10 = vsel %vm1800_vm9, %v1772_v42, %v1388_v59  ;;  %v1788_v27 = vsel %vm1767_vm7, %v1755_v53, %v1292_v52  ;;  %v4289_v4 = vld [vmem:[#allocation62_spill] sm:$0xff] }
 0x1cd   : > { %1177 = vrot.lane.b32.xlu1 %v572_v16, %s2606_s6 }
 0x1ce   : > { %1273 = vrot.lane.b32.xlu0 %v494_v58, %s2607_s7 }
 0x1cf   : > { %v3607_v63 = vpop.permute.xlu1 %1293  ;;  %v3609_v8 = vpop.permute.xlu0 %1007 }
 0x1d0   : > { %v1789_v51 = vsel %vm1767_vm7, %v1756_v45, %v3607_v63  ;;  %v575_v45 = vld [vmem:[#allocation2 + $0x182] sm:$0xff] }
 0x1d1   : > { %1303 = vrot.lane.b32.xlu1 %v509_v3, %s2607_s7 }
 0x1d2   : > { %1399 = vrot.lane.b32.xlu0 %v525_v23, %s2608_s25 }
 0x1d3   : > { %v1420_v43 = vpop.permute.xlu1 %1419  ;;  %v1390_v22 = vpop.permute.xlu0 %1389 }
 0x1d4   : > { %v1821_v48 = vsel %vm1800_vm9, %v1788_v27, %v1420_v43  ;;  %v1806_v19 = vsel %vm1800_vm9, %v1773_v18, %v1390_v22  ;;  %v511_v43 = vld [vmem:[#allocation2 + $0x180] sm:$0xff]  ;;  %v512_v22 = vld [vmem:[#allocation2 + $0x188] sm:$0xff]  ;;  %v2519_v18 = vld [vmem:[#allocation2 + $0x50] sm:$0xff] }
 0x1d5   : > { %1305 = vrot.lane.b32.xlu1 %v510_v11, %s2607_s7  ;;  %v1610_v7 = vsel %vm169_vm0, %v2519_v18, %v4287_v6 }
 0x1d6   : > { %1019 = vrot.lane.b32.xlu0 %v525_v23, %s2605_s5  ;;  %v495_v23 = vld [vmem:[#allocation2 + $0xc0] sm:$0xff] }
 0x1d7   : > { %v3625_v49 = vpop.permute.xlu1 %1039  ;;  %v1516_v47 = vpop.permute.xlu0 %1515 }
 0x1d8   : > { %v1838_v28 = vsel %vm1833_vm8, %v1805_v10, %v1516_v47 }
 0x1d9   : > { %1431 = vrot.lane.b32.xlu1 %v541_v15, %s2608_s25  ;;  %2413 = vmatprep.mubr.msk.f32.mxu0 %vm1878_vm10, %v1838_v28 }
 0x1da   : > { %1401 = vrot.lane.b32.xlu0 %v526_v26, %s2608_s25 }
 0x1db   : > { %v1422_v54 = vpop.permute.xlu1 %1421  ;;  %v3643_v30 = vpop.permute.xlu0 %1009 }
 0x1dc   : > { %v1822_v55 = vsel %vm1800_vm9, %v1789_v51, %v1422_v54 }
 0x1dd   : > { %1051 = vrot.lane.b32.xlu1 %v541_v15, %s2605_s5  ;;  %v4281_v15 = vld [vmem:[#allocation9_spill] sm:$0xff] }
 0x1de   : > { %1527 = vrot.lane.b32.xlu0 %v557_v40, %s2609_s28  ;;  %v1609_v38 = vsel %vm169_vm0, %v2518_v32, %v4281_v15 }
 0x1df   : > { %v1548_v31 = vpop.permute.xlu1 %1547  ;;  %v1136_v14 = vpop.permute.xlu0 %1135 }
 0x1e0   : > { %v1854_v61 = vsel %vm1833_vm8, %v1821_v48, %v1548_v31  ;;  %v4286_v48 = vld [vmem:[#allocation70_spill] sm:$0xff] }
 0x1e1   : > { %1433 = vrot.lane.b32.xlu1 %v542_v25, %s2608_s25  ;;  %2437 = vmatprep.mubr.msk.f32.mxu1 %vm1878_vm10, %v1854_v61 }
 0x1e2   : > { %1021 = vrot.lane.b32.xlu0 %v526_v26, %s2605_s5  ;;  %v1642_v26 = vsel %vm1635_vm3, %v1609_v38, %v3137_v37  ;;  %v4283_v37 = vld [vmem:[#allocation24_spill] sm:$0xff] }
 0x1e3   : > { %v3664_v34 = vpop.permute.xlu1 %1041  ;;  %v1518_v29 = vpop.permute.xlu0 %1517  ;;  %v1675_v50 = vsel %vm1668_vm4, %v1642_v26, %v4282_v41 }
 0x1e4   : > { %v1839_v12 = vsel %vm1833_vm8, %v1806_v19, %v1518_v29  ;;  %v1708_v47 = vsel %vm1701_vm5, %v1675_v50, %v3609_v8  ;;  %v4285_v8 = vld [vmem:[#allocation50_spill] sm:$0xff] }
 0x1e5   : > { %1559 = vrot.lane.b32.xlu1 %v573_v0, %s2609_s28  ;;  %2414 = vmatmul.mubr.msk.f32.gmra.mrb[4].mxu0 %vm1878_vm10, %v1839_v12  ;;  %v1741_v28 = vsel %vm1734_vm6, %v1708_v47, %v1136_v14 }
 0x1e6   : > { %1147 = vrot.lane.b32.xlu0 %v557_v40, %s2606_s6  ;;  %v4284_v40 = vld [vmem:[#allocation31_spill] sm:$0xff] }
 0x1e7   : > { %v1168_v16 = vpop.permute.xlu1 %1167  ;;  %v3683_v52 = vpop.permute.xlu0 %1137  ;;  %v1625_v53 = vsel %vm169_vm0, %v4284_v40, %v4283_v37  ;;  %v529_v37 = vld [vmem:[#allocation2 + $0xd9] sm:$0xff] }
 0x1e8   : > { %v1658_v60 = vsel %vm1635_vm3, %v1625_v53, %v4285_v8  ;;  %v514_v53 = vld [vmem:[#allocation2 + $0x1a0] sm:$0xff] }
 0x1e9   : > { %1053 = vrot.lane.b32.xlu1 %v542_v25, %s2605_s5  ;;  %v1691_v31 = vsel %vm1668_vm4, %v1658_v60, %v4286_v48 }
 0x1ea   : > { %1529 = vrot.lane.b32.xlu0 %v558_v44, %s2609_s28  ;;  %v1724_v61 = vsel %vm1701_vm5, %v1691_v31, %v3625_v49  ;;  %v4288_v49 = vld [vmem:[#allocation42_spill] sm:$0xff]  ;;  %v530_v31 = vld [vmem:[#allocation2 + $0xe1] sm:$0xff] }
 0x1eb   : > { %v1550_v58 = vpop.permute.xlu1 %1549  ;;  %v1264_v3 = vpop.permute.xlu0 %1263  ;;  %v1757_v14 = vsel %vm1734_vm6, %v1724_v61, %v1168_v16  ;;  %v1643_v57 = vsel %vm1635_vm3, %v1610_v7, %v4288_v49  ;;  %v561_v7 = vld [vmem:[#allocation2 + $0xda] sm:$0xff] }
 0x1ec   : > { %v1855_v59 = vsel %vm1833_vm8, %v1822_v55, %v1550_v58  ;;  %v1774_v54 = vsel %vm1767_vm7, %v1741_v28, %v1264_v3  ;;  %v1676_v16 = vsel %vm1668_vm4, %v1643_v57, %v4289_v4  ;;  %v4290_v3 = vld [vmem:[#allocation28_spill] sm:$0xff] }
 0x1ed   : > { %1179 = vrot.lane.b32.xlu1 %v573_v0, %s2606_s6  ;;  %2438 = vmatmul.mubr.msk.f32.gmra.mrb[4].mxu1 %vm1878_vm10, %v1855_v59  ;;  %v2520_v59 = vld [vmem:[#allocation2 + $0x110] sm:$0xff] }
 0x1ee   : > { %1149 = vrot.lane.b32.xlu0 %v558_v44, %s2606_s6  ;;  %v1709_v44 = vsel %vm1701_vm5, %v1676_v16, %v3643_v30  ;;  %v4291_v30 = vld [vmem:[#allocation52_spill] sm:$0xff] }
 0x1ef   : > { %v3694_v24 = vpop.permute.xlu1 %1169  ;;  %v3696_v11 = vpop.permute.xlu0 %1265  ;;  %v1742_v51 = vsel %vm1734_vm6, %v1709_v44, %v3683_v52  ;;  %v4298_v44 = vld [vmem:[#allocation71_spill] sm:$0xff] }
 0x1f0   : > { %v1775_v58 = vsel %vm1767_vm7, %v1742_v51, %v3696_v11 }
 0x1f1   : > { %1561 = vrot.lane.b32.xlu1 %v574_v21, %s2609_s28 }
 0x1f2   : > { %1275 = vrot.lane.b32.xlu0 %v495_v23, %s2607_s7 }
 0x1f3   : > { %v1296_v63 = vpop.permute.xlu1 %1295  ;;  %v1392_v5 = vpop.permute.xlu0 %1391 }
 0x1f4   : > { %v1807_v27 = vsel %vm1800_vm9, %v1774_v54, %v1392_v5  ;;  %v1790_v0 = vsel %vm1767_vm7, %v1757_v14, %v1296_v63  ;;  %v4292_v5 = vld [vmem:[#allocation72_spill] sm:$0xff]  ;;  %v513_v54 = vld [vmem:[#allocation2 + $0x198] sm:$0xff] }
 0x1f5   : > { %1181 = vrot.lane.b32.xlu1 %v574_v21, %s2606_s6  ;;  %v1626_v21 = vsel %vm169_vm0, %v2520_v59, %v4290_v3  ;;  %v562_v59 = vld [vmem:[#allocation2 + $0xe2] sm:$0xff] }
 0x1f6   : > { %1277 = vrot.lane.b32.xlu0 %v496_v9, %s2607_s7  ;;  %v1659_v9 = vsel %vm1635_vm3, %v1626_v21, %v4291_v30  ;;  %v2523_v30 = vld [vmem:[#allocation2 + $0x68] sm:$0xff] }
 0x1f7   : > { %v3702_v36 = vpop.permute.xlu1 %1297  ;;  %v3704_v2 = vpop.permute.xlu0 %1011 }
 0x1f9   : > { %1307 = vrot.lane.b32.xlu1 %v511_v43, %s2607_s7  ;;  %v1692_v43 = vsel %vm1668_vm4, %v1659_v9, %v4292_v5  ;;  %v4299_v9 = vld [vmem:[#allocation16_spill] sm:$0xff] }
 0x1fa   : > { %1403 = vrot.lane.b32.xlu0 %v527_v39, %s2608_s25 }
 0x1fb   : > { %v1424_v42 = vpop.permute.xlu1 %1423  ;;  %v1394_v10 = vpop.permute.xlu0 %1393 }
 0x1fc   : > { %v1823_v19 = vsel %vm1800_vm9, %v1790_v0, %v1424_v42  ;;  %v1808_v23 = vsel %vm1800_vm9, %v1775_v58, %v1394_v10  ;;  %v497_v10 = vld [vmem:[#allocation2 + $0xd8] sm:$0xff] }
 0x1fd   : > { %1309 = vrot.lane.b32.xlu1 %v512_v22, %s2607_s7  ;;  %v560_v22 = vld [vmem:[#allocation2 + $0xca] sm:$0xff]  ;;  %v545_v0 = vld [vmem:[#allocation2 + $0x199] sm:$0xff] }
 0x1fe   : > { %1023 = vrot.lane.b32.xlu0 %v527_v39, %s2605_s5  ;;  %v1725_v39 = vsel %vm1701_vm5, %v1692_v43, %v3664_v34  ;;  %v576_v34 = vld [vmem:[#allocation2 + $0x18a] sm:$0xff]  ;;  %v4300_v43 = vld [vmem:[#allocation44_spill] sm:$0xff] }
 0x1ff   : > { %v3719_v20 = vpop.permute.xlu1 %1043  ;;  %v1520_v25 = vpop.permute.xlu0 %1519  ;;  %v1758_v32 = vsel %vm1734_vm6, %v1725_v39, %v3694_v24 }
 0x200   : > { %v1840_v13 = vsel %vm1833_vm8, %v1807_v27, %v1520_v25  ;;  %v1791_v38 = vsel %vm1767_vm7, %v1758_v32, %v3702_v36  ;;  %v2521_v27 = vld [vmem:[#allocation2 + $0x60] sm:$0xff] }
 0x201   : > { %1435 = vrot.lane.b32.xlu1 %v543_v17, %s2608_s25  ;;  %2416 = vmatprep.mubr.msk.f32.mxu0 %vm1878_vm10, %v1840_v13  ;;  %v4293_v25 = vld [vmem:[#allocation12_spill] sm:$0xff]  ;;  %v4294_v13 = vld [vmem:[#allocation41_spill] sm:$0xff] }
 0x202   : > { %1405 = vrot.lane.b32.xlu0 %v528_v1, %s2608_s25  ;;  %v1611_v8 = vsel %vm169_vm0, %v2521_v27, %v4293_v25 }
 0x203   : > { %v1426_v46 = vpop.permute.xlu1 %1425  ;;  %v3737_v62 = vpop.permute.xlu0 %1013  ;;  %v1644_v48 = vsel %vm1635_vm3, %v1611_v8, %v4294_v13 }
 0x204   : > { %v1824_v42 = vsel %vm1800_vm9, %v1791_v38, %v1426_v46  ;;  %v4295_v46 = vld [vmem:[#allocation61_spill] sm:$0xff] }
 0x205   : > { %1055 = vrot.lane.b32.xlu1 %v543_v17, %s2605_s5  ;;  %v498_v17 = vld [vmem:[#allocation2 + $0xe0] sm:$0xff]  ;;  %v1677_v61 = vsel %vm1668_vm4, %v1644_v48, %v4295_v46 }
 0x206   : > { %1531 = vrot.lane.b32.xlu0 %v559_v33, %s2609_s28  ;;  %v1710_v14 = vsel %vm1701_vm5, %v1677_v61, %v3704_v2  ;;  %v4297_v2 = vld [vmem:[#allocation51_spill] sm:$0xff] }
 0x207   : > { %v1552_v29 = vpop.permute.xlu1 %1551 }
 0x208   : > { %v1856_v12 = vsel %vm1833_vm8, %v1823_v19, %v1552_v29  ;;  %v3750_v56 = vpop.permute.xlu0 %1139  ;;  %v2522_v19 = vld [vmem:[#allocation2 + $0x120] sm:$0xff]  ;;  %v4296_v29 = vld [vmem:[#allocation27_spill] sm:$0xff] }
 0x209   : > { %1437 = vrot.lane.b32.xlu1 %v544_v35, %s2608_s25  ;;  %2440 = vmatprep.mubr.msk.f32.mxu1 %vm1878_vm10, %v1856_v12  ;;  %v1627_v49 = vsel %vm169_vm0, %v2522_v19, %v4296_v29  ;;  %v4306_v29 = vld [vmem:[#allocation43_spill] sm:$0xff] }
 0x20a   : > { %1025 = vrot.lane.b32.xlu0 %v528_v1, %s2605_s5  ;;  %v1660_v4 = vsel %vm1635_vm3, %v1627_v49, %v4297_v2 }
 0x20b   : > { %v3759_v55 = vpop.permute.xlu1 %1045 }
 0x20c   : > { %v1522_v63 = vpop.permute.xlu0 %1521 }
 0x20d   : > { %1563 = vrot.lane.b32.xlu1 %v575_v45, %s2609_s28  ;;  %v1841_v52 = vsel %vm1833_vm8, %v1808_v23, %v1522_v63  ;;  %v577_v63 = vld [vmem:[#allocation2 + $0x19a] sm:$0xff] }
 0x20e   : > { %1151 = vrot.lane.b32.xlu0 %v559_v33, %s2606_s6  ;;  %2417 = vmatmul.mubr.msk.f32.gmra.mrb[6].mxu0 %vm1878_vm10, %v1841_v52  ;;  %v1612_v52 = vsel %vm169_vm0, %v2523_v30, %v4299_v9  ;;  %v4310_v9 = vld [vmem:[#allocation73_spill] sm:$0xff] }
 0x20f   : > { %v3773_v11 = vpop.permute.xlu1 %1171  ;;  %v1645_v39 = vsel %vm1635_vm3, %v1612_v52, %v4300_v43 }
 0x210   : > { %v3780_v15 = vpop.permute.xlu0 %1141 }
 0x211   : > { %1057 = vrot.lane.b32.xlu1 %v544_v35, %s2605_s5  ;;  %v1743_v35 = vsel %vm1734_vm6, %v1710_v14, %v3750_v56  ;;  %v546_v56 = vld [vmem:[#allocation2 + $0x1a1] sm:$0xff] }
 0x212   : > { %1533 = vrot.lane.b32.xlu0 %v560_v22, %s2609_s28 }
 0x213   : > { %v1554_v26 = vpop.permute.xlu1 %1553 }
 0x214   : > { %v1857_v41 = vsel %vm1833_vm8, %v1824_v42, %v1554_v26  ;;  %v1268_v50 = vpop.permute.xlu0 %1267  ;;  %v578_v26 = vld [vmem:[#allocation2 + $0x1a2] sm:$0xff] }
 0x215   : > { %1183 = vrot.lane.b32.xlu1 %v575_v45, %s2606_s6  ;;  %2441 = vmatmul.mubr.msk.f32.gmra.mrb[6].mxu1 %vm1878_vm10, %v1857_v41  ;;  %v1776_v6 = vsel %vm1767_vm7, %v1743_v35, %v1268_v50  ;;  %v1693_v45 = vsel %vm1668_vm4, %v1660_v4, %v4298_v44 }
 0x216   : > { %1153 = vrot.lane.b32.xlu0 %v560_v22, %s2606_s6  ;;  %v1726_v58 = vsel %vm1701_vm5, %v1693_v45, %v3719_v20  ;;  %v4301_v22 = vld [vmem:[#allocation64_spill] sm:$0xff]  ;;  %v2526_v45 = vld [vmem:[#allocation2 + $0x138] sm:$0xff] }
 0x217   : > { %v3791_v24 = vpop.permute.xlu1 %1173  ;;  %v1759_v3 = vsel %vm1734_vm6, %v1726_v58, %v3773_v11  ;;  %v1678_v32 = vsel %vm1668_vm4, %v1645_v39, %v4301_v22  ;;  %v4311_v22 = vld [vmem:[#allocation18_spill] sm:$0xff] }
 0x218   : > { %v3793_v47 = vpop.permute.xlu0 %1269  ;;  %v1711_v42 = vsel %vm1701_vm5, %v1678_v32, %v3737_v62 }
 0x219   : > { %1565 = vrot.lane.b32.xlu1 %v576_v34, %s2609_s28  ;;  %v1744_v41 = vsel %vm1734_vm6, %v1711_v42, %v3780_v15  ;;  %v4304_v15 = vld [vmem:[#allocation74_spill] sm:$0xff] }
 0x21a   : > { %1279 = vrot.lane.b32.xlu0 %v497_v10, %s2607_s7  ;;  %v2524_v10 = vld [vmem:[#allocation2 + $0x128] sm:$0xff] }
 0x21b   : > { %v1300_v36 = vpop.permute.xlu1 %1299 }
 0x21c   : > { %v1396_v28 = vpop.permute.xlu0 %1395  ;;  %v1792_v23 = vsel %vm1767_vm7, %v1759_v3, %v1300_v36  ;;  %v4302_v36 = vld [vmem:[#allocation32_spill] sm:$0xff] }
 0x21d   : > { %1185 = vrot.lane.b32.xlu1 %v576_v34, %s2606_s6  ;;  %v1809_v57 = vsel %vm1800_vm9, %v1776_v6, %v1396_v28  ;;  %v1777_v34 = vsel %vm1767_vm7, %v1744_v41, %v3793_v47 }
 0x21e   : > { %1281 = vrot.lane.b32.xlu0 %v498_v17, %s2607_s7  ;;  %v1628_v17 = vsel %vm169_vm0, %v2524_v10, %v4302_v36  ;;  %v4313_v10 = vld [vmem:[#allocation66_spill] sm:$0xff] }
 0x21f   : > { %v3799_v1 = vpop.permute.xlu1 %1301 }
 0x220   : > { %v3801_v40 = vpop.permute.xlu0 %1015 }
 0x221   : > { %1311 = vrot.lane.b32.xlu1 %v513_v54, %s2607_s7 }
 0x222   : > { %1407 = vrot.lane.b32.xlu0 %v529_v37, %s2608_s25  ;;  %v4303_v37 = vld [vmem:[#allocation54_spill] sm:$0xff] }
 0x223   : > { %v1428_v60 = vpop.permute.xlu1 %1427  ;;  %v1661_v62 = vsel %vm1635_vm3, %v1628_v17, %v4303_v37 }
 0x224   : > { %v1398_v33 = vpop.permute.xlu0 %1397  ;;  %v1825_v5 = vsel %vm1800_vm9, %v1792_v23, %v1428_v60  ;;  %v1694_v27 = vsel %vm1668_vm4, %v1661_v62, %v4304_v15  ;;  %v4309_v23 = vld [vmem:[#allocation53_spill] sm:$0xff]  ;;  %v2528_v62 = vld [vmem:[#allocation2 + $0x140] sm:$0xff] }
 0x225   : > { %1313 = vrot.lane.b32.xlu1 %v514_v53, %s2607_s7  ;;  %v1810_v28 = vsel %vm1800_vm9, %v1777_v34, %v1398_v33  ;;  %v1727_v47 = vsel %vm1701_vm5, %v1694_v27, %v3759_v55  ;;  %s3951_s7 = scalar_lea.vmem [#allocation3], %s2316_s4 }
 0x226   : > { %1409 = vrot.lane.b32.xlu0 %v530_v31, %s2608_s25  ;;  %v1760_v8 = vsel %vm1734_vm6, %v1727_v47, %v3791_v24  ;;  %v2525_v24 = vld [vmem:[#allocation2 + $0x78] sm:$0xff]  ;;  %v4315_v47 = vld [vmem:[#allocation56_spill] sm:$0xff]  ;;  %s2250_s9 = sshll.u32 %s3951_s7, 4  ;;  %s4134_s9 = int_to_ptr.vmem [resolvable:$true] %s2250_s9 }
 0x227   : > { %v3817_v18 = vpop.permute.xlu1 %1047  ;;  %v1793_v13 = vsel %vm1767_vm7, %v1760_v8, %v3799_v1  ;;  %s2537_s19 = scalar_lea.vmem %s4134_s9, 4096  ;;  %p2544_p0 = scmp.lt.s32.totalorder %s4134_s9, %s2542_s24 }
 0x228   : > { %v1524_v12 = vpop.permute.xlu0 %1523  ;;  %p2538_p11 = scmp.ne.s32.totalorder %s4134_s9, %s2537_s19 }
 0x229   : > { %1439 = vrot.lane.b32.xlu1 %v545_v0, %s2608_s25  ;;  %v1842_v16 = vsel %vm1833_vm8, %v1809_v57, %v1524_v12  ;;  %v4307_v57 = vld [vmem:[#allocation63_spill] sm:$0xff] }
 0x22a   : > { %1535 = vrot.lane.b32.xlu0 %v561_v7, %s2609_s28  ;;  %2419 = vmatprep.mubr.msk.f32.mxu0 %vm1878_vm10, %v1842_v16  ;;  %v4305_v7 = vld [vmem:[#allocation15_spill] sm:$0xff]  ;;  %p2539_p12 = pnand %p2538_p11, %p2670_p5 }
 0x22b   : > { %v1430_v51 = vpop.permute.xlu1 %1429  ;;  %v1613_v19 = vsel %vm169_vm0, %v2525_v24, %v4305_v7 }
 0x22c   : > { %v3835_v21 = vpop.permute.xlu0 %1017  ;;  %v1826_v48 = vsel %vm1800_vm9, %v1793_v13, %v1430_v51  ;;  %v1646_v49 = vsel %vm1635_vm3, %v1613_v19, %v4306_v29  ;;  %v4308_v51 = vld [vmem:[#allocation30_spill] sm:$0xff]  ;;  %p2540_p13 = pneg %p2539_p12 }
 0x22d   : > { %1441 = vrot.lane.b32.xlu1 %v546_v56, %s2608_s25  ;;  %v1679_v12 = vsel %vm1668_vm4, %v1646_v49, %v4307_v57  ;;  %v1629_v58 = vsel %vm169_vm0, %v2526_v45, %v4308_v51  ;;  %s2543_s25 = scalar_lea.vmem %s2542_s24, 8192 }
 0x22e   : > { %1537 = vrot.lane.b32.xlu0 %v562_v59, %s2609_s28  ;;  %v1712_v4 = vsel %vm1701_vm5, %v1679_v12, %v3801_v40  ;;  %p2545_p1 = scmp.lt.s32.totalorder %s2543_s25, %s2537_s19 }
 0x22f   : > { %v1556_v20 = vpop.permute.xlu1 %1555 }
 0x230   : > { %v1858_v11 = vsel %vm1833_vm8, %v1825_v5, %v1556_v20  ;;  %v1144_v38 = vpop.permute.xlu0 %1143  ;;  %p2546_p2 = por %p2545_p1, %p2544_p0 }
 0x231   : > { %1567 = vrot.lane.b32.xlu1 %v577_v63, %s2609_s28  ;;  %2443 = vmatprep.mubr.msk.f32.mxu1 %vm1878_vm10, %v1858_v11  ;;  %v1745_v16 = vsel %vm1734_vm6, %v1712_v4, %v1144_v38  ;;  %v1662_v63 = vsel %vm1635_vm3, %v1629_v58, %v4309_v23  ;;  %v2527_v11 = vld [vmem:[#allocation2 + $0x80] sm:$0xff]  ;;  %v4318_v58 = vld [vmem:[#allocation45_spill] sm:$0xff] }
 0x232   : > { %v1695_v40 = vsel %vm1668_vm4, %v1662_v63, %v4310_v9  ;;  %v1614_v32 = vsel %vm169_vm0, %v2527_v11, %v4311_v22  ;;  %v4319_v23 = vld [vmem:[#allocation65_spill] sm:$0xff]  ;;  %v2530_v22 = vld [vmem:[#allocation2 + $0x150] sm:$0xff]  ;;  %p2547_p3 = pnand %p2546_p2, %p2540_p13 }
 0x233   : > { %v3854_v50 = vpop.permute.xlu1 %1049  ;;  %v1728_v5 = vsel %vm1701_vm5, %v1695_v40, %v3817_v18 }
 0x234   : > { %v1526_v54 = vpop.permute.xlu0 %1525 }
 0x235   : > { %1569 = vrot.lane.b32.xlu1 %v578_v26, %s2609_s28  ;;  %v1843_v53 = vsel %vm1833_vm8, %v1810_v28, %v1526_v54  ;;  %v4312_v26 = vld [vmem:[#allocation46_spill] sm:$0xff] }
 0x236   : > { %2420 = vmatmul.mubr.msk.f32.gmra.mrb[8].mxu0 %vm1878_vm10, %v1843_v53  ;;  %v1647_v41 = vsel %vm1635_vm3, %v1614_v32, %v4312_v26  ;;  %v4314_v53 = vld [vmem:[#allocation34_spill] sm:$0xff]  ;;  %v4320_v32 = vld [vmem:[#allocation33_spill] sm:$0xff] }
 0x237   : > { %v1176_v25 = vpop.permute.xlu1 %1175  ;;  %v1680_v18 = vsel %vm1668_vm4, %v1647_v41, %v4313_v10  ;;  %v1630_v15 = vsel %vm169_vm0, %v2528_v62, %v4314_v53  ;;  %v4321_v41 = vld [vmem:[#allocation55_spill] sm:$0xff] }
 0x238   : > { %v1146_v60 = vpop.permute.xlu0 %1145  ;;  %v1761_v20 = vsel %vm1734_vm6, %v1728_v5, %v1176_v25  ;;  %v1713_v17 = vsel %vm1701_vm5, %v1680_v18, %v3835_v21  ;;  %v1663_v8 = vsel %vm1635_vm3, %v1630_v15, %v4315_v47  ;;  %v4316_v21 = vld [vmem:[#allocation76_spill] sm:$0xff]  ;;  %v4322_v10 = vld [vmem:[#allocation75_spill] sm:$0xff] }
 0x239   : > { %v1746_v28 = vsel %vm1734_vm6, %v1713_v17, %v1146_v60  ;;  %v1696_v60 = vsel %vm1668_vm4, %v1663_v8, %v4316_v21  ;;  %v2531_v53 = vld [vmem:[#allocation2 + $0x98] sm:$0xff]  ;;  %v4323_v15 = vld [vmem:[#allocation20_spill] sm:$0xff] }
 0x23a   : > { %v4324_v8 = vld [vmem:[#allocation48_spill] sm:$0xff] }
 0x23b   : > { %v1558_v31 = vpop.permute.xlu1 %1557 }
 0x23c   : > { %v1859_v46 = vsel %vm1833_vm8, %v1826_v48, %v1558_v31  ;;  %v1272_v61 = vpop.permute.xlu0 %1271  ;;  %v1729_v31 = vsel %vm1701_vm5, %v1696_v60, %v3854_v50  ;;  %v3947_v50 = vld [vmem:[%s4184_s2] ss:$0 sm:$0xff] }
 0x23d   : > { %2444 = vmatmul.mubr.msk.f32.gmra.mrb[8].mxu1 %vm1878_vm10, %v1859_v46  ;;  %v1778_v44 = vsel %vm1767_vm7, %v1745_v16, %v1272_v61  ;;  %v2529_v16 = vld [vmem:[#allocation2 + $0x90] sm:$0xff]  ;;  %v4325_v60 = vld [vmem:[#allocation68_spill] sm:$0xff] }
 0x23f   : > { %v1178_v33 = vpop.permute.xlu1 %1177 }
 0x240   : > { %v1274_v14 = vpop.permute.xlu0 %1273  ;;  %v1762_v46 = vsel %vm1734_vm6, %v1729_v31, %v1178_v33 }
 0x241   : > { %v1779_v37 = vsel %vm1767_vm7, %v1746_v28, %v1274_v14 }
 0x243   : > { %v1304_v0 = vpop.permute.xlu1 %1303 }
 0x244   : > { %v1400_v35 = vpop.permute.xlu0 %1399  ;;  %v1794_v39 = vsel %vm1767_vm7, %v1761_v20, %v1304_v0 }
 0x245   : > { %v1811_v59 = vsel %vm1800_vm9, %v1778_v44, %v1400_v35  ;;  %v4317_v44 = vld [vmem:[#allocation17_spill] sm:$0xff] }
 0x246   : > { %v1615_v45 = vsel %vm169_vm0, %v2529_v16, %v4317_v44 }
 0x247   : > { %v1306_v55 = vpop.permute.xlu1 %1305 }
 0x248   : > { %v3877_v6 = vpop.permute.xlu0 %1019  ;;  %v1795_v14 = vsel %vm1767_vm7, %v1762_v46, %v1306_v55 }
 0x24b   : > { %v1432_v1 = vpop.permute.xlu1 %1431 }
 0x24c   : > { %v1402_v2 = vpop.permute.xlu0 %1401  ;;  %v1827_v38 = vsel %vm1800_vm9, %v1794_v39, %v1432_v1 }
 0x24d   : > { %v1812_v27 = vsel %vm1800_vm9, %v1779_v37, %v1402_v2 }
 0x24f   : > { %v3888_v56 = vpop.permute.xlu1 %1051 }
 0x250   : > { %v1528_v3 = vpop.permute.xlu0 %1527 }
 0x251   : > { %v1844_v30 = vsel %vm1833_vm8, %v1811_v59, %v1528_v3  ;;  %v1648_v59 = vsel %vm1635_vm3, %v1615_v45, %v4318_v58 }
 0x252   : > { %2422 = vmatprep.mubr.msk.f32.mxu0 %vm1878_vm10, %v1844_v30  ;;  %v1681_v63 = vsel %vm1668_vm4, %v1648_v59, %v4319_v23 }
 0x253   : > { %v1434_v52 = vpop.permute.xlu1 %1433 }
 0x254   : > { %v3903_v43 = vpop.permute.xlu0 %1021  ;;  %v1828_v0 = vsel %vm1800_vm9, %v1795_v14, %v1434_v52  ;;  %v1714_v52 = vsel %vm1701_vm5, %v1681_v63, %v3877_v6 }
 0x257   : > { %v1560_v42 = vpop.permute.xlu1 %1559 }
 0x258   : > { %v1860_v34 = vsel %vm1833_vm8, %v1827_v38, %v1560_v42  ;;  %v1148_v36 = vpop.permute.xlu0 %1147  ;;  %v1631_v38 = vsel %vm169_vm0, %v2530_v22, %v4320_v32  ;;  %v4330_v22 = vld [vmem:[#allocation47_spill] sm:$0xff] }
 0x259   : > { %2446 = vmatprep.mubr.msk.f32.mxu1 %vm1878_vm10, %v1860_v34  ;;  %v1747_v20 = vsel %vm1734_vm6, %v1714_v52, %v1148_v36  ;;  %v1664_v6 = vsel %vm1635_vm3, %v1631_v38, %v4321_v41 }
 0x25a   : > { %v1697_v18 = vsel %vm1668_vm4, %v1664_v6, %v4322_v10 }
 0x25b   : > { %v3918_v54 = vpop.permute.xlu1 %1053  ;;  %v1730_v17 = vsel %vm1701_vm5, %v1697_v18, %v3888_v56 }
 0x25c   : > { %v1530_v25 = vpop.permute.xlu0 %1529 }
 0x25d   : > { %v1845_v13 = vsel %vm1833_vm8, %v1812_v27, %v1530_v25  ;;  %v1616_v27 = vsel %vm169_vm0, %v2531_v53, %v4323_v15  ;;  %v4333_v15 = vld [vmem:[#allocation49_spill] sm:$0xff] }
 0x25e   : > { %2423 = vmatmul.mubr.msk.f32.gmra.mrb[10].mxu0 %vm1878_vm10, %v1845_v13  ;;  %v1649_v13 = vsel %vm1635_vm3, %v1616_v27, %v4324_v8  ;;  %v4334_v8 = vld [vmem:[#allocation35_spill] sm:$0xff] }
 0x25f   : > { %v1180_v48 = vpop.permute.xlu1 %1179  ;;  %v1682_v56 = vsel %vm1668_vm4, %v1649_v13, %v4325_v60  ;;  %v4335_v13 = vld [vmem:[#allocation69_spill] sm:$0xff] }
 0x260   : > { %v3933_v61 = vpop.permute.xlu0 %1149  ;;  %v1763_v28 = vsel %vm1734_vm6, %v1730_v17, %v1180_v48  ;;  %v1715_v31 = vsel %vm1701_vm5, %v1682_v56, %v3903_v43  ;;  %v4328_v43 = vld [vmem:[#allocation78_spill] sm:$0xff]  ;;  %v4332_v17 = vld [vmem:[#allocation21_spill] sm:$0xff] }
 0x261   : > { %v1748_v46 = vsel %vm1734_vm6, %v1715_v31, %v3933_v61  ;;  %v4336_v31 = vld [vmem:[#allocation57_spill] sm:$0xff] }
 0x263   : > { %v1562_v35 = vpop.permute.xlu1 %1561 }
 0x264   : > { %v1861_v24 = vsel %vm1833_vm8, %v1828_v0, %v1562_v35  ;;  %v1276_v7 = vpop.permute.xlu0 %1275  ;;  %v2532_v35 = vld [vmem:[#allocation2 + $0x158] sm:$0xff] }
 0x265   : > { %2447 = vmatmul.mubr.msk.f32.gmra.mrb[10].mxu1 %vm1878_vm10, %v1861_v24  ;;  %v1780_v11 = vsel %vm1767_vm7, %v1747_v20, %v1276_v7  ;;  %v4326_v24 = vld [vmem:[#allocation36_spill] sm:$0xff] }
 0x266   : > { %v1632_v7 = vsel %vm169_vm0, %v2532_v35, %v4326_v24  ;;  %v4337_v35 = vld [vmem:[#allocation77_spill] sm:$0xff] }
 0x267   : > { %v3939_v19 = vpop.permute.xlu1 %1181 }
 0x268   : > { %v1278_v1 = vpop.permute.xlu0 %1277 }
 0x269   : > { %v1781_v0 = vsel %vm1767_vm7, %v1748_v46, %v1278_v1 }
 0x26b   : > { %v1308_v29 = vpop.permute.xlu1 %1307 }
 0x26c   : > { %v1404_v33 = vpop.permute.xlu0 %1403  ;;  %v2409_v55 = vpop.f32.mrb[0].mxu0  ;;  %v1796_v62 = vsel %vm1767_vm7, %v1763_v28, %v1308_v29 }
 0x26d   : > { %v2051_v49 = vadd.f32 %v2409_v55, %v3947_v50  ;;  %v2045_v57 = vpop.f32.mrb[1].mxu0  ;;  %v1813_v42 = vsel %vm1800_vm9, %v1780_v11, %v1404_v33  ;;  %v4327_v55 = vld [vmem:[#allocation58_spill] sm:$0xff] }
 0x26e   : > { %v2046_v2 = vadd.f32 %v3947_v50, %v2045_v57 }
 0x26f   : > { %v1310_v12 = vpop.permute.xlu1 %1309  ;;  %2205 = vst [vmem:[%s3951_s7 + $0x8] sm:$0xff] %v2051_v49  ;;  %v1665_v49 = vsel %vm1635_vm3, %v1632_v7, %v4327_v55 }
 0x270   : > { %v3954_v4 = vpop.permute.xlu0 %1023  ;;  %2204 = vst [vmem:[%s3951_s7] sm:$0xff] %v2046_v2  ;;  %v1698_v2 = vsel %vm1668_vm4, %v1665_v49, %v4328_v43  ;;  %v2536_v49 = vld [vmem:[#allocation2 + $0x170] sm:$0xff] }
 0x271   : > { %v1731_v1 = vsel %vm1701_vm5, %v1698_v2, %v3918_v54 }
 0x272   : > { %v1764_v16 = vsel %vm1734_vm6, %v1731_v1, %v3939_v19 }
 0x273   : > { %v1436_v51 = vpop.permute.xlu1 %1435  ;;  %v1797_v45 = vsel %vm1767_vm7, %v1764_v16, %v1310_v12  ;;  %v2533_v12 = vld [vmem:[#allocation2 + $0xa8] sm:$0xff]  ;;  %v4339_v16 = vld [vmem:[#allocation59_spill] sm:$0xff] }
 0x274   : > { %v2433_v3 = vpop.f32.mrb[0].mxu1  ;;  %v1406_v9 = vpop.permute.xlu0 %1405  ;;  %v1829_v25 = vsel %vm1800_vm9, %v1796_v62, %v1436_v51 }
 0x275   : > { %v2131_v30 = vadd.f32 %v2433_v3, %v3947_v50  ;;  %v2125_v40 = vpop.f32.mrb[1].mxu1  ;;  %v1814_v29 = vsel %vm1800_vm9, %v1781_v0, %v1406_v9 }
 0x276   : > { %v2126_v5 = vadd.f32 %v3947_v50, %v2125_v40 }
 0x277   : > { %2221 = vst [vmem:[%s3951_s7 + $0x88] sm:$0xff] %v2131_v30  ;;  %v3969_v39 = vpop.permute.xlu1 %1055 }
 0x278   : > { %2220 = vst [vmem:[%s3951_s7 + $0x80] sm:$0xff] %v2126_v5  ;;  %v1532_v26 = vpop.permute.xlu0 %1531  ;;  %v4329_v5 = vld [vmem:[#allocation19_spill] sm:$0xff] }
 0x279   : > { %v1846_v34 = vsel %vm1833_vm8, %v1813_v42, %v1532_v26  ;;  %v1617_v20 = vsel %vm169_vm0, %v2533_v12, %v4329_v5  ;;  %v4331_v42 = vld [vmem:[#allocation67_spill] sm:$0xff] }
 0x27a   : > { %2425 = vmatprep.mubr.msk.f32.mxu0 %vm1878_vm10, %v1846_v34  ;;  %v1650_v32 = vsel %vm1635_vm3, %v1617_v20, %v4330_v22 }
 0x27b   : > { %v1438_v36 = vpop.permute.xlu1 %1437  ;;  %v1683_v26 = vsel %vm1668_vm4, %v1650_v32, %v4331_v42 }
 0x27c   : > { %v3985_v37 = vpop.permute.xlu0 %1025  ;;  %v1830_v51 = vsel %vm1800_vm9, %v1797_v45, %v1438_v36  ;;  %v1716_v10 = vsel %vm1701_vm5, %v1683_v26, %v3954_v4  ;;  %v2534_v36 = vld [vmem:[#allocation2 + $0xb0] sm:$0xff] }
 0x27d   : > { %v1618_v28 = vsel %vm169_vm0, %v2534_v36, %v4332_v17 }
 0x27e   : > { %v1651_v27 = vsel %vm1635_vm3, %v1618_v28, %v4333_v15 }
 0x27f   : > { %v1564_v47 = vpop.permute.xlu1 %1563 }
 0x280   : > { %v1862_v21 = vsel %vm1833_vm8, %v1829_v25, %v1564_v47  ;;  %v1152_v48 = vpop.permute.xlu0 %1151  ;;  %v2535_v47 = vld [vmem:[#allocation2 + $0x168] sm:$0xff] }
 0x281   : > { %2449 = vmatprep.mubr.msk.f32.mxu1 %vm1878_vm10, %v1862_v21  ;;  %v1749_v62 = vsel %vm1734_vm6, %v1716_v10, %v1152_v48  ;;  %v1633_v4 = vsel %vm169_vm0, %v2535_v47, %v4334_v8  ;;  %v1684_v21 = vsel %vm1668_vm4, %v1651_v27, %v4335_v13 }
 0x282   : > { %v1666_v48 = vsel %vm1635_vm3, %v1633_v4, %v4336_v31  ;;  %v1717_v46 = vsel %vm1701_vm5, %v1684_v21, %v3985_v37 }
 0x283   : > { %v4001_v14 = vpop.permute.xlu1 %1057  ;;  %v1699_v24 = vsel %vm1668_vm4, %v1666_v48, %v4337_v35 }
 0x284   : > { %v1534_v33 = vpop.permute.xlu0 %1533 }
 0x285   : > { %v1847_v57 = vsel %vm1833_vm8, %v1814_v29, %v1534_v33  ;;  %v1732_v33 = vsel %vm1701_vm5, %v1699_v24, %v3969_v39 }
 0x286   : > { %2426 = vmatmul.mubr.msk.f32.gmra.mrb[12].mxu0 %vm1878_vm10, %v1847_v57  ;;  %v4338_v57 = vld [vmem:[#allocation37_spill] sm:$0xff] }
 0x287   : > { %v1184_v61 = vpop.permute.xlu1 %1183  ;;  %v1634_v43 = vsel %vm169_vm0, %v2536_v49, %v4338_v57 }
 0x288   : > { %v1154_v44 = vpop.permute.xlu0 %1153  ;;  %v1765_v37 = vsel %vm1734_vm6, %v1732_v33, %v1184_v61 }
 0x289   : > { %v1750_v7 = vsel %vm1734_vm6, %v1717_v46, %v1154_v44  ;;  %v1667_v44 = vsel %vm1635_vm3, %v1634_v43, %v4339_v16 }
 0x28b   : > { %v1566_v58 = vpop.permute.xlu1 %1565 }
 0x28c   : > { %v1863_v59 = vsel %vm1833_vm8, %v1830_v51, %v1566_v58  ;;  %v1280_v3 = vpop.permute.xlu0 %1279  ;;  %v4340_v58 = vld [vmem:[#allocation79_spill] sm:$0xff] }
 0x28d   : > { %2450 = vmatmul.mubr.msk.f32.gmra.mrb[12].mxu1 %vm1878_vm10, %v1863_v59  ;;  %v1782_v25 = vsel %vm1767_vm7, %v1749_v62, %v1280_v3  ;;  %v1700_v39 = vsel %vm1668_vm4, %v1667_v44, %v4340_v58 }
 0x28e   : > { %v1733_v61 = vsel %vm1701_vm5, %v1700_v39, %v4001_v14 }
 0x28f   : > { %v1186_v23 = vpop.permute.xlu1 %1185 }
 0x290   : > { %v1282_v63 = vpop.permute.xlu0 %1281  ;;  %v2412_v30 = vpop.f32.mrb[2].mxu0 }
 0x291   : > { %v2061_v54 = vadd.f32 %v2412_v30, %v3947_v50  ;;  %v2055_v40 = vpop.f32.mrb[3].mxu0  ;;  %v1783_v55 = vsel %vm1767_vm7, %v1750_v7, %v1282_v63  ;;  %v1766_v30 = vsel %vm1734_vm6, %v1733_v61, %v1186_v23 }
 0x292   : > { %v2056_v19 = vadd.f32 %v3947_v50, %v2055_v40 }
 0x293   : > { %v1312_v9 = vpop.permute.xlu1 %1311  ;;  %2207 = vst [vmem:[%s3951_s7 + $0x18] sm:$0xff] %v2061_v54 }
 0x294   : > { %v1408_v52 = vpop.permute.xlu0 %1407  ;;  %2206 = vst [vmem:[%s3951_s7 + $0x10] sm:$0xff] %v2056_v19  ;;  %v1798_v45 = vsel %vm1767_vm7, %v1765_v37, %v1312_v9 }
 0x295   : > { %v1815_v60 = vsel %vm1800_vm9, %v1782_v25, %v1408_v52 }
 0x297   : > { %v1314_v11 = vpop.permute.xlu1 %1313 }
 0x298   : > { %v2436_v38 = vpop.f32.mrb[2].mxu1  ;;  %v1410_v6 = vpop.permute.xlu0 %1409  ;;  %v1799_v54 = vsel %vm1767_vm7, %v1766_v30, %v1314_v11 }
 0x299   : > { %v2141_v41 = vadd.f32 %v2436_v38, %v3947_v50  ;;  %v2135_v34 = vpop.f32.mrb[3].mxu1  ;;  %v1816_v2 = vsel %vm1800_vm9, %v1783_v55, %v1410_v6 }
 0x29a   : > { %v2136_v18 = vadd.f32 %v3947_v50, %v2135_v34 }
 0x29b   : > { %2223 = vst [vmem:[%s3951_s7 + $0x98] sm:$0xff] %v2141_v41  ;;  %v1440_v53 = vpop.permute.xlu1 %1439 }
 0x29c   : > { %2222 = vst [vmem:[%s3951_s7 + $0x90] sm:$0xff] %v2136_v18  ;;  %v1536_v56 = vpop.permute.xlu0 %1535  ;;  %v1831_v59 = vsel %vm1800_vm9, %v1798_v45, %v1440_v53 }
 0x29d   : > { %v1848_v0 = vsel %vm1833_vm8, %v1815_v60, %v1536_v56 }
 0x29e   : > { %2428 = vmatprep.mubr.msk.f32.mxu0 %vm1878_vm10, %v1848_v0 }
 0x29f   : > { %v1442_v29 = vpop.permute.xlu1 %1441 }
 0x2a0   : > { %v1538_v1 = vpop.permute.xlu0 %1537  ;;  %v1832_v9 = vsel %vm1800_vm9, %v1799_v54, %v1442_v29 }
 0x2a1   : > { %v1849_v51 = vsel %vm1833_vm8, %v1816_v2, %v1538_v1 }
 0x2a2   : > { %2429 = vmatmul.mubr.msk.f32.gmra.mrb[14].mxu0 %vm1878_vm10, %v1849_v51 }
 0x2a3   : > { %v1568_v3 = vpop.permute.xlu1 %1567 }
 0x2a4   : > { %v1864_v63 = vsel %vm1833_vm8, %v1831_v59, %v1568_v3 }
 0x2a5   : > { %2452 = vmatprep.mubr.msk.f32.mxu1 %vm1878_vm10, %v1864_v63 }
 0x2a7   : > { %v1570_v40 = vpop.permute.xlu1 %1569 }
 0x2a8   : > { %v1865_v19 = vsel %vm1833_vm8, %v1832_v9, %v1570_v40 }
 0x2a9   : > { %2453 = vmatmul.mubr.msk.f32.gmra.mrb[14].mxu1 %vm1878_vm10, %v1865_v19 }
 0x2b8   : > { %v2415_v52 = vpop.f32.mrb[4].mxu0 }
 0x2b9   : > { %v2071_v14 = vadd.f32 %v2415_v52, %v3947_v50  ;;  %v2065_v12 = vpop.f32.mrb[5].mxu0 }
 0x2ba   : > { %v2066_v23 = vadd.f32 %v3947_v50, %v2065_v12 }
 0x2bb   : > { %2209 = vst [vmem:[%s3951_s7 + $0x28] sm:$0xff] %v2071_v14 }
 0x2bc   : > { %2208 = vst [vmem:[%s3951_s7 + $0x20] sm:$0xff] %v2066_v23 }
 0x2c0   : > { %v2439_v5 = vpop.f32.mrb[4].mxu1 }
 0x2c1   : > { %v2151_v20 = vadd.f32 %v2439_v5, %v3947_v50  ;;  %v2145_v11 = vpop.f32.mrb[5].mxu1 }
 0x2c2   : > { %v2146_v22 = vadd.f32 %v3947_v50, %v2145_v11 }
 0x2c3   : > { %2225 = vst [vmem:[%s3951_s7 + $0xa8] sm:$0xff] %v2151_v20 }
 0x2c4   : > { %2224 = vst [vmem:[%s3951_s7 + $0xa0] sm:$0xff] %v2146_v22 }
 0x2e1   : > { %v2418_v32 = vpop.f32.mrb[6].mxu0 }
 0x2e2   : > { %v2081_v38 = vadd.f32 %v2418_v32, %v3947_v50  ;;  %v2075_v42 = vpop.f32.mrb[7].mxu0 }
 0x2e3   : > { %v2076_v26 = vadd.f32 %v3947_v50, %v2075_v42 }
 0x2e4   : > { %2211 = vst [vmem:[%s3951_s7 + $0x38] sm:$0xff] %v2081_v38 }
 0x2e5   : > { %2210 = vst [vmem:[%s3951_s7 + $0x30] sm:$0xff] %v2076_v26 }
 0x2e8   : > { %v2442_v41 = vpop.f32.mrb[6].mxu1 }
 0x2e9   : > { %v2161_v6 = vadd.f32 %v2442_v41, %v3947_v50  ;;  %v2155_v34 = vpop.f32.mrb[7].mxu1 }
 0x2ea   : > { %v2156_v10 = vadd.f32 %v3947_v50, %v2155_v34 }
 0x2eb   : > { %2227 = vst [vmem:[%s3951_s7 + $0xb8] sm:$0xff] %v2161_v6 }
 0x2ec   : > { %2226 = vst [vmem:[%s3951_s7 + $0xb0] sm:$0xff] %v2156_v10 }
 0x309   : > { %v2421_v18 = vpop.f32.mrb[8].mxu0 }
 0x30a   : > { %v2091_v36 = vadd.f32 %v2421_v18, %v3947_v50  ;;  %v2085_v17 = vpop.f32.mrb[9].mxu0 }
 0x30b   : > { %v2086_v28 = vadd.f32 %v3947_v50, %v2085_v17 }
 0x30c   : > { %2213 = vst [vmem:[%s3951_s7 + $0x48] sm:$0xff] %v2091_v36 }
 0x30d   : > { %2212 = vst [vmem:[%s3951_s7 + $0x40] sm:$0xff] %v2086_v28 }
 0x310   : > { %v2445_v62 = vpop.f32.mrb[8].mxu1 }
 0x311   : > { %v2171_v53 = vadd.f32 %v2445_v62, %v3947_v50  ;;  %v2165_v15 = vpop.f32.mrb[9].mxu1 }
 0x312   : > { %v2166_v27 = vadd.f32 %v3947_v50, %v2165_v15 }
 0x313   : > { %2229 = vst [vmem:[%s3951_s7 + $0xc8] sm:$0xff] %v2171_v53 }
 0x314   : > { %2228 = vst [vmem:[%s3951_s7 + $0xc0] sm:$0xff] %v2166_v27 }
 0x331   : > { %v2424_v25 = vpop.f32.mrb[10].mxu0 }
 0x332   : > { %v2101_v47 = vadd.f32 %v2424_v25, %v3947_v50  ;;  %v2095_v8 = vpop.f32.mrb[11].mxu0 }
 0x333   : > { %v2096_v4 = vadd.f32 %v3947_v50, %v2095_v8 }
 0x334   : > { %2215 = vst [vmem:[%s3951_s7 + $0x58] sm:$0xff] %v2101_v47 }
 0x335   : > { %2214 = vst [vmem:[%s3951_s7 + $0x50] sm:$0xff] %v2096_v4 }
 0x338   : > { %v2448_v13 = vpop.f32.mrb[10].mxu1 }
 0x339   : > { %v2181_v21 = vadd.f32 %v2448_v13, %v3947_v50  ;;  %v2175_v60 = vpop.f32.mrb[11].mxu1 }
 0x33a   : > { %v2176_v56 = vadd.f32 %v3947_v50, %v2175_v60 }
 0x33b   : > { %2231 = vst [vmem:[%s3951_s7 + $0xd8] sm:$0xff] %v2181_v21 }
 0x33c   : > { %2230 = vst [vmem:[%s3951_s7 + $0xd0] sm:$0xff] %v2176_v56 }
 0x359   : > { %v2427_v31 = vpop.f32.mrb[12].mxu0 }
 0x35a   : > { %v2111_v48 = vadd.f32 %v2427_v31, %v3947_v50  ;;  %v2105_v46 = vpop.f32.mrb[13].mxu0 }
 0x35b   : > { %v2106_v0 = vadd.f32 %v3947_v50, %v2105_v46 }
 0x35c   : > { %2217 = vst [vmem:[%s3951_s7 + $0x68] sm:$0xff] %v2111_v48 }
 0x35d   : > { %2216 = vst [vmem:[%s3951_s7 + $0x60] sm:$0xff] %v2106_v0 }
 0x360   : > { %v2451_v35 = vpop.f32.mrb[12].mxu1 }
 0x361   : > { %v2191_v24 = vadd.f32 %v2451_v35, %v3947_v50  ;;  %v2185_v7 = vpop.f32.mrb[13].mxu1 }
 0x362   : > { %v2186_v29 = vadd.f32 %v3947_v50, %v2185_v7 }
 0x363   : > { %2233 = vst [vmem:[%s3951_s7 + $0xe8] sm:$0xff] %v2191_v24 }
 0x364   : > { %2232 = vst [vmem:[%s3951_s7 + $0xe0] sm:$0xff] %v2186_v29 }
 0x375   : > { %v2430_v33 = vpop.f32.mrb[14].mxu0 }
 0x376   : > { %v2121_v55 = vadd.f32 %v2430_v33, %v3947_v50  ;;  %v2115_v49 = vpop.f32.mrb[15].mxu0 }
 0x377   : > { %v2116_v57 = vadd.f32 %v3947_v50, %v2115_v49 }
 0x378   : > { %2219 = vst [vmem:[%s3951_s7 + $0x78] sm:$0xff] %v2121_v55 }
 0x379   : > { %2218 = vst [vmem:[%s3951_s7 + $0x70] sm:$0xff] %v2116_v57 }
 0x37c   : > { %v2454_v43 = vpop.f32.mrb[14].mxu1 }
 0x37d   : > { %v2201_v37 = vadd.f32 %v2454_v43, %v3947_v50  ;;  %v2195_v2 = vpop.f32.mrb[15].mxu1 }
 0x37e   : > { %v2196_v1 = vadd.f32 %v3947_v50, %v2195_v2 }
 0x37f   : > { %2235 = vst [vmem:[%s3951_s7 + $0xf8] sm:$0xff] %v2201_v37 }
 0x380   : > { %2234 = vst [vmem:[%s3951_s7 + $0xf0] sm:$0xff] %v2196_v1 }
 0x381   : > { %2550 = shalt.err (!%p2547_p3)
}
 0x382   : > { %s2551_s26 = scalar_lea.hbm %s4131_s17, 4096  ;;  %s2555_s29 = scalar_lea.hbm %s4185_s3, 8192 }
 0x383   : > { %p2552_p4 = scmp.ne.s32.totalorder %s4131_s17, %s2551_s26  ;;  %p2556_p9 = scmp.lt.u32.totalorder %s4131_s17, %s4185_s3 }
 0x384   : > { %p2557_p10 = scmp.lt.u32.totalorder %s2555_s29, %s2551_s26  ;;  %p2559_p12 = scmp.lt.u32.totalorder %s2551_s26, %s4131_s17 }
 0x385   : > { %p2553_p7 = pnand %p2552_p4, %p2670_p5 }
 0x386   : > { %p2558_p11 = por %p2557_p10, %p2556_p9 }
 0x387   : > { %p2554_p8 = pneg %p2553_p7 }
 0x388   : > { %p2560_p13 = por %p2559_p12, %p2558_p11 }
 0x38a   : > { %p2561_p0 = pnand %p2560_p13, %p2554_p8 }
 0x38c   : > { %2564 = shalt.err (!%p2561_p0)
}
 0x38d   : > { %s2611_s6 = smov 128  }
 0x38e   : > { %2469 = dma.vmem_to_hbm [thread:$0]  (%p2670_p5), %s4134_s9, 4096, %s4131_s17, %s4140_s16, %s2611_s6, %s2611_s6, %s2603_s30  }
 0x38f PF: > { %p2475_p1 = scmp.ge.s32.totalorder %s2599_s15, 2  ;;  %s2265_s7 = sand.u32 1, %s2587_s12  }
 0x390   : > { %s2266_s8 = scalar_lea.sflag [#allocation4], %s2265_s7 }
 0x391   : > { %p2472_p2 = pnand %p2475_p1, %p2674_p6 }
 0x393   : > { %2582 = dma.done.wait (!%p2472_p2), %s2266_s8, 4096  }
 0x394   : > { %2584 = vsyncadd (!%p2472_p2), %s2266_s8, 4294963200  ;;  %p13_p3 = scmp.ge.s32.totalorder %s2657_s18, 4   ;;  %s4341_s12 = smov %s2591_s13 }
 0x395   : > { %s4342_s13 = smov %s2595_s14  ;;  %s4343_s14 = smov %s2668_s21 }
 0x396   : > { %s4344_s15 = smov %s2657_s18  ;;  %15 = sbr.rel (!%p13_p3) target bundleno = 3 (0x3), region = 69 }
 0x39d   :  { %2271 = vsyncpa [#allocation4], 1 }
 0x39e   :  { %2273 = vsyncpa [#allocation4 + $0x1], 1 }

</bundles_post_ra>
